<compile_context>
chip_gen: v7x
topology: tpu7x:2x2x1
jax: 0.10.0
libtpu: 0.0.40
codegen_flags: <defaults>
</compile_context>

<pallas_src>
import functools

import jax
import jax.numpy as jnp
from jax.experimental import pallas as pl
from jax.experimental.pallas import tpu as pltpu


def lstm_kernel(x2d_ref, h0_ref, c0_ref,
                wih0T_ref, b0_ref, wA_ref, whh1T_ref, b1_ref,
                wlinT_ref, blin_ref,
                out_ref, hT_ref, cT_ref,
                *, T, B, H):
    """2-layer LSTM wavefront + linear + log_softmax; everything resident in VMEM."""
    G = 4 * H                      # gate width per layer (PyTorch gate order i, f, g, o)
    mm_dtype = wA_ref.dtype        # MXU operand dtype (f32 or bf16)

    # Hoisted layer-0 input projection for ALL timesteps: one large MXU matmul; the
    # layer-0 bias (i/f/o columns already pre-scaled by 0.5 on the host) is folded in
    # with a single broadcast outside the loop.
    xg_all = (jnp.dot(x2d_ref[...], wih0T_ref[...],
                      preferred_element_type=jnp.float32)
              + b0_ref[...])                                           # (T*B, 4H) f32

    # Hoisted weight loads / broadcasts (JAX does not CSE broadcast_in_dim, so do them
    # once rather than per unrolled step).
    wA = wA_ref[...]               # (H, 8H) = [whh0^T | wih1^T], i/f/o cols pre-scaled
    whh1T = whh1T_ref[...]         # (H, 4H), i/f/o cols pre-scaled
    b1b = jnp.broadcast_to(b1_ref[...], (B, G))                        # (B, 4H)
    # Lane mask selecting the g-gate columns [2H, 3H) of a (B, 4H) gate vreg.
    col = jax.lax.broadcasted_iota(jnp.int32, (B, G), 1)
    is_g = (col >= 2 * H) & (col < 3 * H)

    def cell(pre, c):
        # One full-vreg tanh replaces 3x sigmoid + 1x tanh on 32-lane slices.  The
        # i/f/o pre-activations arrive pre-scaled by 0.5, so sigmoid(x) = 0.5*tanh(x/2)
        # + 0.5 falls out of a single tanh followed by a VPU select.
        t = jnp.tanh(pre)                                              # 1 EUP push
        act = jnp.where(is_g, t, 0.5 * t + 0.5)                        # (B, 4H)
        i = act[:, 0 * H:1 * H]
        f = act[:, 1 * H:2 * H]
        g = act[:, 2 * H:3 * H]
        o = act[:, 3 * H:4 * H]
        c_new = f * c + i * g
        h_new = o * jnp.tanh(c_new)                                    # 1 EUP push
        return h_new, c_new

    h0 = h0_ref[0]
    c0 = c0_ref[0]
    h1 = h0_ref[1]
    c1 = c0_ref[1]

    # Wavefront over T+1 steps: at step s, layer 0 consumes input step s (s < T) and
    # layer 1 consumes layer-0's output from step s-1 (s >= 1); at the start of step s,
    # `h0` holds exactly that value.  Two small K=H MXU pushes per step (no concat,
    # no zero block):
    #   h0 @ [whh0^T | wih1^T] -> [gates0_rec | gates1_in],   h1 @ whh1^T -> gates1_rec
    # T=8 here, so the loop stays fully unrolled (static) for LLO visibility.
    for s in range(T + 1):
        g_all0 = jnp.dot(h0.astype(mm_dtype), wA,
                         preferred_element_type=jnp.float32)           # (B, 8H)
        if s >= 1:
            g1 = jnp.dot(h1.astype(mm_dtype), whh1T,
                         preferred_element_type=jnp.float32)           # (B, 4H)
            h1, c1 = cell(g_all0[:, G:2 * G] + g1 + b1b, c1)
        if s < T:
            h0, c0 = cell(g_all0[:, 0:G] + xg_all[s * B:(s + 1) * B, :], c0)

    # Final states (PyTorch returns (num_layers, batch, hidden)).
    hT_ref[0] = h0
    hT_ref[1] = h1
    cT_ref[0] = c0
    cT_ref[1] = c1

    # Linear + numerically stable log_softmax on lstm_out[-1] (== h1); one-time
    # epilogue kept in f32.
    logits = (jnp.dot(h1, wlinT_ref[...], preferred_element_type=jnp.float32)
              + blin_ref[...])
    shifted = logits - jnp.max(logits, axis=1, keepdims=True)
    lse = jnp.log(jnp.sum(jnp.exp(shifted), axis=1, keepdims=True))
    out_ref[...] = shifted - lse


def lstm_forward(x, h0, c0, params, *, matmul_dtype=jnp.float32):
    T, B, I = x.shape
    L, _, H = h0.shape
    assert L == 2
    wih0, whh0, bih0, bhh0, wih1, whh1, bih1, bhh1, wlin, blin = params
    OUT = wlin.shape[0]
    G = 4 * H

    # sigmoid-via-tanh fold: pre-scale the i/f/o gate columns (NOT the g columns) by
    # 0.5 in every weight/bias that feeds a gate pre-activation.
    scale = jnp.concatenate([jnp.full((2 * H,), 0.5, jnp.float32),   # i, f
                             jnp.ones((H,), jnp.float32),            # g
                             jnp.full((H,), 0.5, jnp.float32)])      # o
    scale2 = jnp.concatenate([scale, scale])

    # Pad batch to the f32 sublane width (8) so vreg rows / MXU M-dim aren't 75%
    # masked.  Batch rows are independent; padded rows are sliced off afterwards.
    # NOTE: if the production batch is large, pad/pack toward 128-256 rows instead —
    # batch is the single biggest MXU-utilization lever for this kernel.
    BP = max(8, -(-B // 8) * 8)
    pb = BP - B
    x_p = jnp.pad(x, ((0, 0), (0, pb), (0, 0)))
    h0_p = jnp.pad(h0, ((0, 0), (0, pb), (0, 0)))
    c0_p = jnp.pad(c0, ((0, 0), (0, pb), (0, 0)))
    x2d = x_p.reshape(T * BP, I).astype(matmul_dtype)        # host-side reshape, free

    # Host-side weight prep: pre-transpose, fold bias pairs, fold the 0.5 gate scale,
    # build the [whh0^T | wih1^T] block, and cast MXU operands to matmul_dtype.
    wih0T = (wih0.T * scale[None, :]).astype(matmul_dtype)             # (I, 4H)
    wA = (jnp.concatenate([whh0.T, wih1.T], axis=1)
          * scale2[None, :]).astype(matmul_dtype)                      # (H, 8H)
    whh1T = (whh1.T * scale[None, :]).astype(matmul_dtype)             # (H, 4H)
    b0 = ((bih0 + bhh0) * scale).reshape(1, G).astype(jnp.float32)
    b1 = ((bih1 + bhh1) * scale).reshape(1, G).astype(jnp.float32)
    wlinT = wlin.T.astype(jnp.float32)                                 # (H, OUT)
    blin2 = blin.reshape(1, OUT).astype(jnp.float32)

    vmem = pl.BlockSpec(memory_space=pltpu.MemorySpace.VMEM)
    kernel = functools.partial(lstm_kernel, T=T, B=BP, H=H)

    scores_p, hT_p, cT_p = pl.pallas_call(
        kernel,
        out_shape=(
            jax.ShapeDtypeStruct((BP, OUT), jnp.float32),
            jax.ShapeDtypeStruct((L, BP, H), jnp.float32),
            jax.ShapeDtypeStruct((L, BP, H), jnp.float32),
        ),
        in_specs=[vmem] * 10,
        out_specs=(vmem, vmem, vmem),
    )(x2d, h0_p, c0_p, wih0T, b0, wA, whh1T, b1, wlinT, blin2)

    return scores_p[:B], hT_p[:, :B], cT_p[:, :B]


def lstm_reference(x, h0, c0, params):
    """Pure-JAX reference mirroring nn.LSTM(num_layers=2) + Linear + log_softmax."""
    wih0, whh0, bih0, bhh0, wih1, whh1, bih1, bhh1, wlin, blin = params
    H = h0.shape[2]

    def run_layer(seq, h, c, wih, whh, bih, bhh):
        outs = []
        for t in range(seq.shape[0]):
            gates = seq[t] @ wih.T + h @ whh.T + bih + bhh
            i = jax.nn.sigmoid(gates[:, 0 * H:1 * H])
            f = jax.nn.sigmoid(gates[:, 1 * H:2 * H])
            g = jnp.tanh(gates[:, 2 * H:3 * H])
            o = jax.nn.sigmoid(gates[:, 3 * H:4 * H])
            c = f * c + i * g
            h = o * jnp.tanh(c)
            outs.append(h)
        return jnp.stack(outs), h, c

    seq0, h_f0, c_f0 = run_layer(x, h0[0], c0[0], wih0, whh0, bih0, bhh0)
    seq1, h_f1, c_f1 = run_layer(seq0, h0[1], c0[1], wih1, whh1, bih1, bhh1)
    logits = seq1[-1] @ wlin.T + blin
    scores = jax.nn.log_softmax(logits, axis=1)
    return scores, jnp.stack([h_f0, h_f1]), jnp.stack([c_f0, c_f1])


if __name__ == "__main__":
    # small shapes consistent with the module: input_dim=16, hidden=32, batch=2,
    # seq=8, output_dim=8, num_layers=2
    T, B, I, H, OUT, L = 8, 2, 16, 32, 8, 2

    key = jax.random.PRNGKey(0)
    ks = jax.random.split(key, 16)
    bound = 1.0 / jnp.sqrt(H)

    def u(k, shape):
        return jax.random.uniform(k, shape, jnp.float32, -bound, bound)

    params = (
        u(ks[0], (4 * H, I)),   # w_ih layer 0
        u(ks[1], (4 * H, H)),   # w_hh layer 0
        u(ks[2], (4 * H,)),     # b_ih layer 0
        u(ks[3], (4 * H,)),     # b_hh layer 0
        u(ks[4], (4 * H, H)),   # w_ih layer 1
        u(ks[5], (4 * H, H)),   # w_hh layer 1
        u(ks[6], (4 * H,)),     # b_ih layer 1
        u(ks[7], (4 * H,)),     # b_hh layer 1
        u(ks[8], (OUT, H)),     # linear weight
        u(ks[9], (OUT,)),       # linear bias
    )

    x = jax.random.normal(ks[10], (T, B, I), jnp.float32)
    h0 = jnp.zeros((L, B, H), jnp.float32)   # init_hidden()
    c0 = jnp.zeros((L, B, H), jnp.float32)

    ref_scores, ref_h, ref_c = lstm_reference(x, h0, c0, params)

    # f32 MXU operands: strict reference check.
    scores, h_f, c_f = lstm_forward(x, h0, c0, params, matmul_dtype=jnp.float32)
    jax.block_until_ready((scores, h_f, c_f))
    assert jnp.allclose(scores, ref_scores, atol=1e-5, rtol=1e-5)
    assert jnp.allclose(h_f, ref_h, atol=1e-5, rtol=1e-5)
    assert jnp.allclose(c_f, ref_c, atol=1e-5, rtol=1e-5)

    # bf16 MXU operands (single MXU pass per recurrent matmul): bf16-level tolerance.
    scores_b, h_b, c_b = lstm_forward(x, h0, c0, params, matmul_dtype=jnp.bfloat16)
    jax.block_until_ready((scores_b, h_b, c_b))
    assert jnp.allclose(scores_b, ref_scores, atol=5e-2, rtol=5e-2)
    assert jnp.allclose(h_b, ref_h, atol=5e-2, rtol=5e-2)
    assert jnp.allclose(c_b, ref_c, atol=5e-2, rtol=5e-2)

    print("KERNEL_OK")
</pallas_src>

<mosaic_0001>
module attributes {stable_mosaic.version = 11 : i64} {
  func.func @lstm_kernel(%arg0: memref<64x16xf32, #tpu.memory_space<vmem>>, %arg1: memref<2x8x32xf32, #tpu.memory_space<vmem>>, %arg2: memref<2x8x32xf32, #tpu.memory_space<vmem>>, %arg3: memref<16x128xf32, #tpu.memory_space<vmem>>, %arg4: memref<1x128xf32, #tpu.memory_space<vmem>>, %arg5: memref<32x256xf32, #tpu.memory_space<vmem>>, %arg6: memref<32x128xf32, #tpu.memory_space<vmem>>, %arg7: memref<1x128xf32, #tpu.memory_space<vmem>>, %arg8: memref<32x8xf32, #tpu.memory_space<vmem>>, %arg9: memref<1x8xf32, #tpu.memory_space<vmem>>, %arg10: memref<8x8xf32, #tpu.memory_space<vmem>>, %arg11: memref<2x8x32xf32, #tpu.memory_space<vmem>>, %arg12: memref<2x8x32xf32, #tpu.memory_space<vmem>>) attributes {dimension_semantics = [], scalar_prefetch = 0 : i64, scratch_operands = 0 : i64, tpu.core_type = #tpu.core_type<tc>} {
    %c0 = arith.constant 0 : index
    %c0_0 = arith.constant 0 : index
    %0 = vector.load %arg0[%c0, %c0_0] : memref<64x16xf32, #tpu.memory_space<vmem>>, vector<64x16xf32>
    %c0_1 = arith.constant 0 : index
    %c0_2 = arith.constant 0 : index
    %1 = vector.load %arg3[%c0_1, %c0_2] : memref<16x128xf32, #tpu.memory_space<vmem>>, vector<16x128xf32>
    %cst = arith.constant dense<0.000000e+00> : vector<64x128xf32>
    %2 = tpu.matmul %0, %1, %cst {dimension_numbers = #tpu.dot_dimension_numbers<[1], [0], [0], [1], [0, 0, 1, 1], [], []>} : vector<64x16xf32>, vector<16x128xf32>, vector<64x128xf32> -> vector<64x128xf32>
    %c0_3 = arith.constant 0 : index
    %c0_4 = arith.constant 0 : index
    %3 = vector.load %arg4[%c0_3, %c0_4] : memref<1x128xf32, #tpu.memory_space<vmem>>, vector<1x128xf32>
    %4 = vector.broadcast %3 : vector<1x128xf32> to vector<64x128xf32>
    %5 = arith.addf %2, %4 : vector<64x128xf32>
    %c0_5 = arith.constant 0 : index
    %c0_6 = arith.constant 0 : index
    %6 = vector.load %arg5[%c0_5, %c0_6] : memref<32x256xf32, #tpu.memory_space<vmem>>, vector<32x256xf32>
    %c0_7 = arith.constant 0 : index
    %c0_8 = arith.constant 0 : index
    %7 = vector.load %arg6[%c0_7, %c0_8] : memref<32x128xf32, #tpu.memory_space<vmem>>, vector<32x128xf32>
    %c0_9 = arith.constant 0 : index
    %c0_10 = arith.constant 0 : index
    %8 = vector.load %arg7[%c0_9, %c0_10] : memref<1x128xf32, #tpu.memory_space<vmem>>, vector<1x128xf32>
    %9 = vector.shape_cast %8 : vector<1x128xf32> to vector<1x128xf32>
    %10 = vector.broadcast %9 : vector<1x128xf32> to vector<8x128xf32>
    %11 = tpu.iota {dimensions = array<i32: 1>} : vector<8x128xi32>
    %c64_i32 = arith.constant 64 : i32
    %12 = vector.broadcast %c64_i32 : i32 to vector<8x128xi32>
    %13 = arith.cmpi sge, %11, %12 : vector<8x128xi32>
    %c96_i32 = arith.constant 96 : i32
    %14 = vector.broadcast %c96_i32 : i32 to vector<8x128xi32>
    %15 = arith.cmpi slt, %11, %14 : vector<8x128xi32>
    %16 = arith.andi %13, %15 : vector<8x128xi1>
    %c0_11 = arith.constant 0 : index
    %c0_12 = arith.constant 0 : index
    %c0_13 = arith.constant 0 : index
    %17 = vector.load %arg1[%c0_11, %c0_12, %c0_13] : memref<2x8x32xf32, #tpu.memory_space<vmem>>, vector<1x8x32xf32>
    %18 = vector.shape_cast %17 : vector<1x8x32xf32> to vector<8x32xf32>
    %c0_14 = arith.constant 0 : index
    %c0_15 = arith.constant 0 : index
    %c0_16 = arith.constant 0 : index
    %19 = vector.load %arg2[%c0_14, %c0_15, %c0_16] : memref<2x8x32xf32, #tpu.memory_space<vmem>>, vector<1x8x32xf32>
    %20 = vector.shape_cast %19 : vector<1x8x32xf32> to vector<8x32xf32>
    %c1 = arith.constant 1 : index
    %c0_17 = arith.constant 0 : index
    %c0_18 = arith.constant 0 : index
    %21 = vector.load %arg1[%c1, %c0_17, %c0_18] : memref<2x8x32xf32, #tpu.memory_space<vmem>>, vector<1x8x32xf32>
    %22 = vector.shape_cast %21 : vector<1x8x32xf32> to vector<8x32xf32>
    %c1_19 = arith.constant 1 : index
    %c0_20 = arith.constant 0 : index
    %c0_21 = arith.constant 0 : index
    %23 = vector.load %arg2[%c1_19, %c0_20, %c0_21] : memref<2x8x32xf32, #tpu.memory_space<vmem>>, vector<1x8x32xf32>
    %24 = vector.shape_cast %23 : vector<1x8x32xf32> to vector<8x32xf32>
    %cst_22 = arith.constant dense<0.000000e+00> : vector<8x256xf32>
    %25 = tpu.matmul %18, %6, %cst_22 {dimension_numbers = #tpu.dot_dimension_numbers<[1], [0], [0], [1], [0, 0, 1, 1], [], []>} : vector<8x32xf32>, vector<32x256xf32>, vector<8x256xf32> -> vector<8x256xf32>
    %26 = vector.extract_strided_slice %25 {offsets = [0, 0], sizes = [8, 128], strides = [1, 1]} : vector<8x256xf32> to vector<8x128xf32>
    %27 = vector.extract_strided_slice %5 {offsets = [0, 0], sizes = [8, 128], strides = [1, 1]} : vector<64x128xf32> to vector<8x128xf32>
    %28 = arith.addf %26, %27 : vector<8x128xf32>
    %29 = math.tanh %28 : vector<8x128xf32>
    %cst_23 = arith.constant 5.000000e-01 : f32
    %30 = vector.broadcast %cst_23 : f32 to vector<8x128xf32>
    %31 = arith.mulf %30, %29 : vector<8x128xf32>
    %cst_24 = arith.constant 5.000000e-01 : f32
    %32 = vector.broadcast %cst_24 : f32 to vector<8x128xf32>
    %33 = arith.addf %31, %32 : vector<8x128xf32>
    %34 = arith.select %16, %29, %33 : vector<8x128xi1>, vector<8x128xf32>
    %35 = vector.extract_strided_slice %34 {offsets = [0, 0], sizes = [8, 32], strides = [1, 1]} : vector<8x128xf32> to vector<8x32xf32>
    %36 = vector.extract_strided_slice %34 {offsets = [0, 32], sizes = [8, 32], strides = [1, 1]} : vector<8x128xf32> to vector<8x32xf32>
    %37 = vector.extract_strided_slice %34 {offsets = [0, 64], sizes = [8, 32], strides = [1, 1]} : vector<8x128xf32> to vector<8x32xf32>
    %38 = vector.extract_strided_slice %34 {offsets = [0, 96], sizes = [8, 32], strides = [1, 1]} : vector<8x128xf32> to vector<8x32xf32>
    %39 = arith.mulf %36, %20 : vector<8x32xf32>
    %40 = arith.mulf %35, %37 : vector<8x32xf32>
    %41 = arith.addf %39, %40 : vector<8x32xf32>
    %42 = math.tanh %41 : vector<8x32xf32>
    %43 = arith.mulf %38, %42 : vector<8x32xf32>
    %cst_25 = arith.constant dense<0.000000e+00> : vector<8x256xf32>
    %44 = tpu.matmul %43, %6, %cst_25 {dimension_numbers = #tpu.dot_dimension_numbers<[1], [0], [0], [1], [0, 0, 1, 1], [], []>} : vector<8x32xf32>, vector<32x256xf32>, vector<8x256xf32> -> vector<8x256xf32>
    %cst_26 = arith.constant dense<0.000000e+00> : vector<8x128xf32>
    %45 = tpu.matmul %22, %7, %cst_26 {dimension_numbers = #tpu.dot_dimension_numbers<[1], [0], [0], [1], [0, 0, 1, 1], [], []>} : vector<8x32xf32>, vector<32x128xf32>, vector<8x128xf32> -> vector<8x128xf32>
    %46 = vector.extract_strided_slice %44 {offsets = [0, 128], sizes = [8, 128], strides = [1, 1]} : vector<8x256xf32> to vector<8x128xf32>
    %47 = arith.addf %46, %45 : vector<8x128xf32>
    %48 = arith.addf %47, %10 : vector<8x128xf32>
    %49 = math.tanh %48 : vector<8x128xf32>
    %cst_27 = arith.constant 5.000000e-01 : f32
    %50 = vector.broadcast %cst_27 : f32 to vector<8x128xf32>
    %51 = arith.mulf %50, %49 : vector<8x128xf32>
    %cst_28 = arith.constant 5.000000e-01 : f32
    %52 = vector.broadcast %cst_28 : f32 to vector<8x128xf32>
    %53 = arith.addf %51, %52 : vector<8x128xf32>
    %54 = arith.select %16, %49, %53 : vector<8x128xi1>, vector<8x128xf32>
    %55 = vector.extract_strided_slice %54 {offsets = [0, 0], sizes = [8, 32], strides = [1, 1]} : vector<8x128xf32> to vector<8x32xf32>
    %56 = vector.extract_strided_slice %54 {offsets = [0, 32], sizes = [8, 32], strides = [1, 1]} : vector<8x128xf32> to vector<8x32xf32>
    %57 = vector.extract_strided_slice %54 {offsets = [0, 64], sizes = [8, 32], strides = [1, 1]} : vector<8x128xf32> to vector<8x32xf32>
    %58 = vector.extract_strided_slice %54 {offsets = [0, 96], sizes = [8, 32], strides = [1, 1]} : vector<8x128xf32> to vector<8x32xf32>
    %59 = arith.mulf %56, %24 : vector<8x32xf32>
    %60 = arith.mulf %55, %57 : vector<8x32xf32>
    %61 = arith.addf %59, %60 : vector<8x32xf32>
    %62 = math.tanh %61 : vector<8x32xf32>
    %63 = arith.mulf %58, %62 : vector<8x32xf32>
    %64 = vector.extract_strided_slice %44 {offsets = [0, 0], sizes = [8, 128], strides = [1, 1]} : vector<8x256xf32> to vector<8x128xf32>
    %65 = vector.extract_strided_slice %5 {offsets = [8, 0], sizes = [8, 128], strides = [1, 1]} : vector<64x128xf32> to vector<8x128xf32>
    %66 = arith.addf %64, %65 : vector<8x128xf32>
    %67 = math.tanh %66 : vector<8x128xf32>
    %cst_29 = arith.constant 5.000000e-01 : f32
    %68 = vector.broadcast %cst_29 : f32 to vector<8x128xf32>
    %69 = arith.mulf %68, %67 : vector<8x128xf32>
    %cst_30 = arith.constant 5.000000e-01 : f32
    %70 = vector.broadcast %cst_30 : f32 to vector<8x128xf32>
    %71 = arith.addf %69, %70 : vector<8x128xf32>
    %72 = arith.select %16, %67, %71 : vector<8x128xi1>, vector<8x128xf32>
    %73 = vector.extract_strided_slice %72 {offsets = [0, 0], sizes = [8, 32], strides = [1, 1]} : vector<8x128xf32> to vector<8x32xf32>
    %74 = vector.extract_strided_slice %72 {offsets = [0, 32], sizes = [8, 32], strides = [1, 1]} : vector<8x128xf32> to vector<8x32xf32>
    %75 = vector.extract_strided_slice %72 {offsets = [0, 64], sizes = [8, 32], strides = [1, 1]} : vector<8x128xf32> to vector<8x32xf32>
    %76 = vector.extract_strided_slice %72 {offsets = [0, 96], sizes = [8, 32], strides = [1, 1]} : vector<8x128xf32> to vector<8x32xf32>
    %77 = arith.mulf %74, %41 : vector<8x32xf32>
    %78 = arith.mulf %73, %75 : vector<8x32xf32>
    %79 = arith.addf %77, %78 : vector<8x32xf32>
    %80 = math.tanh %79 : vector<8x32xf32>
    %81 = arith.mulf %76, %80 : vector<8x32xf32>
    %cst_31 = arith.constant dense<0.000000e+00> : vector<8x256xf32>
    %82 = tpu.matmul %81, %6, %cst_31 {dimension_numbers = #tpu.dot_dimension_numbers<[1], [0], [0], [1], [0, 0, 1, 1], [], []>} : vector<8x32xf32>, vector<32x256xf32>, vector<8x256xf32> -> vector<8x256xf32>
    %cst_32 = arith.constant dense<0.000000e+00> : vector<8x128xf32>
    %83 = tpu.matmul %63, %7, %cst_32 {dimension_numbers = #tpu.dot_dimension_numbers<[1], [0], [0], [1], [0, 0, 1, 1], [], []>} : vector<8x32xf32>, vector<32x128xf32>, vector<8x128xf32> -> vector<8x128xf32>
    %84 = vector.extract_strided_slice %82 {offsets = [0, 128], sizes = [8, 128], strides = [1, 1]} : vector<8x256xf32> to vector<8x128xf32>
    %85 = arith.addf %84, %83 : vector<8x128xf32>
    %86 = arith.addf %85, %10 : vector<8x128xf32>
    %87 = math.tanh %86 : vector<8x128xf32>
    %cst_33 = arith.constant 5.000000e-01 : f32
    %88 = vector.broadcast %cst_33 : f32 to vector<8x128xf32>
    %89 = arith.mulf %88, %87 : vector<8x128xf32>
    %cst_34 = arith.constant 5.000000e-01 : f32
    %90 = vector.broadcast %cst_34 : f32 to vector<8x128xf32>
    %91 = arith.addf %89, %90 : vector<8x128xf32>
    %92 = arith.select %16, %87, %91 : vector<8x128xi1>, vector<8x128xf32>
    %93 = vector.extract_strided_slice %92 {offsets = [0, 0], sizes = [8, 32], strides = [1, 1]} : vector<8x128xf32> to vector<8x32xf32>
    %94 = vector.extract_strided_slice %92 {offsets = [0, 32], sizes = [8, 32], strides = [1, 1]} : vector<8x128xf32> to vector<8x32xf32>
    %95 = vector.extract_strided_slice %92 {offsets = [0, 64], sizes = [8, 32], strides = [1, 1]} : vector<8x128xf32> to vector<8x32xf32>
    %96 = vector.extract_strided_slice %92 {offsets = [0, 96], sizes = [8, 32], strides = [1, 1]} : vector<8x128xf32> to vector<8x32xf32>
    %97 = arith.mulf %94, %61 : vector<8x32xf32>
    %98 = arith.mulf %93, %95 : vector<8x32xf32>
    %99 = arith.addf %97, %98 : vector<8x32xf32>
    %100 = math.tanh %99 : vector<8x32xf32>
    %101 = arith.mulf %96, %100 : vector<8x32xf32>
    %102 = vector.extract_strided_slice %82 {offsets = [0, 0], sizes = [8, 128], strides = [1, 1]} : vector<8x256xf32> to vector<8x128xf32>
    %103 = vector.extract_strided_slice %5 {offsets = [16, 0], sizes = [8, 128], strides = [1, 1]} : vector<64x128xf32> to vector<8x128xf32>
    %104 = arith.addf %102, %103 : vector<8x128xf32>
    %105 = math.tanh %104 : vector<8x128xf32>
    %cst_35 = arith.constant 5.000000e-01 : f32
    %106 = vector.broadcast %cst_35 : f32 to vector<8x128xf32>
    %107 = arith.mulf %106, %105 : vector<8x128xf32>
    %cst_36 = arith.constant 5.000000e-01 : f32
    %108 = vector.broadcast %cst_36 : f32 to vector<8x128xf32>
    %109 = arith.addf %107, %108 : vector<8x128xf32>
    %110 = arith.select %16, %105, %109 : vector<8x128xi1>, vector<8x128xf32>
    %111 = vector.extract_strided_slice %110 {offsets = [0, 0], sizes = [8, 32], strides = [1, 1]} : vector<8x128xf32> to vector<8x32xf32>
    %112 = vector.extract_strided_slice %110 {offsets = [0, 32], sizes = [8, 32], strides = [1, 1]} : vector<8x128xf32> to vector<8x32xf32>
    %113 = vector.extract_strided_slice %110 {offsets = [0, 64], sizes = [8, 32], strides = [1, 1]} : vector<8x128xf32> to vector<8x32xf32>
    %114 = vector.extract_strided_slice %110 {offsets = [0, 96], sizes = [8, 32], strides = [1, 1]} : vector<8x128xf32> to vector<8x32xf32>
    %115 = arith.mulf %112, %79 : vector<8x32xf32>
    %116 = arith.mulf %111, %113 : vector<8x32xf32>
    %117 = arith.addf %115, %116 : vector<8x32xf32>
    %118 = math.tanh %117 : vector<8x32xf32>
    %119 = arith.mulf %114, %118 : vector<8x32xf32>
    %cst_37 = arith.constant dense<0.000000e+00> : vector<8x256xf32>
    %120 = tpu.matmul %119, %6, %cst_37 {dimension_numbers = #tpu.dot_dimension_numbers<[1], [0], [0], [1], [0, 0, 1, 1], [], []>} : vector<8x32xf32>, vector<32x256xf32>, vector<8x256xf32> -> vector<8x256xf32>
    %cst_38 = arith.constant dense<0.000000e+00> : vector<8x128xf32>
    %121 = tpu.matmul %101, %7, %cst_38 {dimension_numbers = #tpu.dot_dimension_numbers<[1], [0], [0], [1], [0, 0, 1, 1], [], []>} : vector<8x32xf32>, vector<32x128xf32>, vector<8x128xf32> -> vector<8x128xf32>
    %122 = vector.extract_strided_slice %120 {offsets = [0, 128], sizes = [8, 128], strides = [1, 1]} : vector<8x256xf32> to vector<8x128xf32>
    %123 = arith.addf %122, %121 : vector<8x128xf32>
    %124 = arith.addf %123, %10 : vector<8x128xf32>
    %125 = math.tanh %124 : vector<8x128xf32>
    %cst_39 = arith.constant 5.000000e-01 : f32
    %126 = vector.broadcast %cst_39 : f32 to vector<8x128xf32>
    %127 = arith.mulf %126, %125 : vector<8x128xf32>
    %cst_40 = arith.constant 5.000000e-01 : f32
    %128 = vector.broadcast %cst_40 : f32 to vector<8x128xf32>
    %129 = arith.addf %127, %128 : vector<8x128xf32>
    %130 = arith.select %16, %125, %129 : vector<8x128xi1>, vector<8x128xf32>
    %131 = vector.extract_strided_slice %130 {offsets = [0, 0], sizes = [8, 32], strides = [1, 1]} : vector<8x128xf32> to vector<8x32xf32>
    %132 = vector.extract_strided_slice %130 {offsets = [0, 32], sizes = [8, 32], strides = [1, 1]} : vector<8x128xf32> to vector<8x32xf32>
    %133 = vector.extract_strided_slice %130 {offsets = [0, 64], sizes = [8, 32], strides = [1, 1]} : vector<8x128xf32> to vector<8x32xf32>
    %134 = vector.extract_strided_slice %130 {offsets = [0, 96], sizes = [8, 32], strides = [1, 1]} : vector<8x128xf32> to vector<8x32xf32>
    %135 = arith.mulf %132, %99 : vector<8x32xf32>
    %136 = arith.mulf %131, %133 : vector<8x32xf32>
    %137 = arith.addf %135, %136 : vector<8x32xf32>
    %138 = math.tanh %137 : vector<8x32xf32>
    %139 = arith.mulf %134, %138 : vector<8x32xf32>
    %140 = vector.extract_strided_slice %120 {offsets = [0, 0], sizes = [8, 128], strides = [1, 1]} : vector<8x256xf32> to vector<8x128xf32>
    %141 = vector.extract_strided_slice %5 {offsets = [24, 0], sizes = [8, 128], strides = [1, 1]} : vector<64x128xf32> to vector<8x128xf32>
    %142 = arith.addf %140, %141 : vector<8x128xf32>
    %143 = math.tanh %142 : vector<8x128xf32>
    %cst_41 = arith.constant 5.000000e-01 : f32
    %144 = vector.broadcast %cst_41 : f32 to vector<8x128xf32>
    %145 = arith.mulf %144, %143 : vector<8x128xf32>
    %cst_42 = arith.constant 5.000000e-01 : f32
    %146 = vector.broadcast %cst_42 : f32 to vector<8x128xf32>
    %147 = arith.addf %145, %146 : vector<8x128xf32>
    %148 = arith.select %16, %143, %147 : vector<8x128xi1>, vector<8x128xf32>
    %149 = vector.extract_strided_slice %148 {offsets = [0, 0], sizes = [8, 32], strides = [1, 1]} : vector<8x128xf32> to vector<8x32xf32>
    %150 = vector.extract_strided_slice %148 {offsets = [0, 32], sizes = [8, 32], strides = [1, 1]} : vector<8x128xf32> to vector<8x32xf32>
    %151 = vector.extract_strided_slice %148 {offsets = [0, 64], sizes = [8, 32], strides = [1, 1]} : vector<8x128xf32> to vector<8x32xf32>
    %152 = vector.extract_strided_slice %148 {offsets = [0, 96], sizes = [8, 32], strides = [1, 1]} : vector<8x128xf32> to vector<8x32xf32>
    %153 = arith.mulf %150, %117 : vector<8x32xf32>
    %154 = arith.mulf %149, %151 : vector<8x32xf32>
    %155 = arith.addf %153, %154 : vector<8x32xf32>
    %156 = math.tanh %155 : vector<8x32xf32>
    %157 = arith.mulf %152, %156 : vector<8x32xf32>
    %cst_43 = arith.constant dense<0.000000e+00> : vector<8x256xf32>
    %158 = tpu.matmul %157, %6, %cst_43 {dimension_numbers = #tpu.dot_dimension_numbers<[1], [0], [0], [1], [0, 0, 1, 1], [], []>} : vector<8x32xf32>, vector<32x256xf32>, vector<8x256xf32> -> vector<8x256xf32>
    %cst_44 = arith.constant dense<0.000000e+00> : vector<8x128xf32>
    %159 = tpu.matmul %139, %7, %cst_44 {dimension_numbers = #tpu.dot_dimension_numbers<[1], [0], [0], [1], [0, 0, 1, 1], [], []>} : vector<8x32xf32>, vector<32x128xf32>, vector<8x128xf32> -> vector<8x128xf32>
    %160 = vector.extract_strided_slice %158 {offsets = [0, 128], sizes = [8, 128], strides = [1, 1]} : vector<8x256xf32> to vector<8x128xf32>
    %161 = arith.addf %160, %159 : vector<8x128xf32>
    %162 = arith.addf %161, %10 : vector<8x128xf32>
    %163 = math.tanh %162 : vector<8x128xf32>
    %cst_45 = arith.constant 5.000000e-01 : f32
    %164 = vector.broadcast %cst_45 : f32 to vector<8x128xf32>
    %165 = arith.mulf %164, %163 : vector<8x128xf32>
    %cst_46 = arith.constant 5.000000e-01 : f32
    %166 = vector.broadcast %cst_46 : f32 to vector<8x128xf32>
    %167 = arith.addf %165, %166 : vector<8x128xf32>
    %168 = arith.select %16, %163, %167 : vector<8x128xi1>, vector<8x128xf32>
    %169 = vector.extract_strided_slice %168 {offsets = [0, 0], sizes = [8, 32], strides = [1, 1]} : vector<8x128xf32> to vector<8x32xf32>
    %170 = vector.extract_strided_slice %168 {offsets = [0, 32], sizes = [8, 32], strides = [1, 1]} : vector<8x128xf32> to vector<8x32xf32>
    %171 = vector.extract_strided_slice %168 {offsets = [0, 64], sizes = [8, 32], strides = [1, 1]} : vector<8x128xf32> to vector<8x32xf32>
    %172 = vector.extract_strided_slice %168 {offsets = [0, 96], sizes = [8, 32], strides = [1, 1]} : vector<8x128xf32> to vector<8x32xf32>
    %173 = arith.mulf %170, %137 : vector<8x32xf32>
    %174 = arith.mulf %169, %171 : vector<8x32xf32>
    %175 = arith.addf %173, %174 : vector<8x32xf32>
    %176 = math.tanh %175 : vector<8x32xf32>
    %177 = arith.mulf %172, %176 : vector<8x32xf32>
    %178 = vector.extract_strided_slice %158 {offsets = [0, 0], sizes = [8, 128], strides = [1, 1]} : vector<8x256xf32> to vector<8x128xf32>
    %179 = vector.extract_strided_slice %5 {offsets = [32, 0], sizes = [8, 128], strides = [1, 1]} : vector<64x128xf32> to vector<8x128xf32>
    %180 = arith.addf %178, %179 : vector<8x128xf32>
    %181 = math.tanh %180 : vector<8x128xf32>
    %cst_47 = arith.constant 5.000000e-01 : f32
    %182 = vector.broadcast %cst_47 : f32 to vector<8x128xf32>
    %183 = arith.mulf %182, %181 : vector<8x128xf32>
    %cst_48 = arith.constant 5.000000e-01 : f32
    %184 = vector.broadcast %cst_48 : f32 to vector<8x128xf32>
    %185 = arith.addf %183, %184 : vector<8x128xf32>
    %186 = arith.select %16, %181, %185 : vector<8x128xi1>, vector<8x128xf32>
    %187 = vector.extract_strided_slice %186 {offsets = [0, 0], sizes = [8, 32], strides = [1, 1]} : vector<8x128xf32> to vector<8x32xf32>
    %188 = vector.extract_strided_slice %186 {offsets = [0, 32], sizes = [8, 32], strides = [1, 1]} : vector<8x128xf32> to vector<8x32xf32>
    %189 = vector.extract_strided_slice %186 {offsets = [0, 64], sizes = [8, 32], strides = [1, 1]} : vector<8x128xf32> to vector<8x32xf32>
    %190 = vector.extract_strided_slice %186 {offsets = [0, 96], sizes = [8, 32], strides = [1, 1]} : vector<8x128xf32> to vector<8x32xf32>
    %191 = arith.mulf %188, %155 : vector<8x32xf32>
    %192 = arith.mulf %187, %189 : vector<8x32xf32>
    %193 = arith.addf %191, %192 : vector<8x32xf32>
    %194 = math.tanh %193 : vector<8x32xf32>
    %195 = arith.mulf %190, %194 : vector<8x32xf32>
    %cst_49 = arith.constant dense<0.000000e+00> : vector<8x256xf32>
    %196 = tpu.matmul %195, %6, %cst_49 {dimension_numbers = #tpu.dot_dimension_numbers<[1], [0], [0], [1], [0, 0, 1, 1], [], []>} : vector<8x32xf32>, vector<32x256xf32>, vector<8x256xf32> -> vector<8x256xf32>
    %cst_50 = arith.constant dense<0.000000e+00> : vector<8x128xf32>
    %197 = tpu.matmul %177, %7, %cst_50 {dimension_numbers = #tpu.dot_dimension_numbers<[1], [0], [0], [1], [0, 0, 1, 1], [], []>} : vector<8x32xf32>, vector<32x128xf32>, vector<8x128xf32> -> vector<8x128xf32>
    %198 = vector.extract_strided_slice %196 {offsets = [0, 128], sizes = [8, 128], strides = [1, 1]} : vector<8x256xf32> to vector<8x128xf32>
    %199 = arith.addf %198, %197 : vector<8x128xf32>
    %200 = arith.addf %199, %10 : vector<8x128xf32>
    %201 = math.tanh %200 : vector<8x128xf32>
    %cst_51 = arith.constant 5.000000e-01 : f32
    %202 = vector.broadcast %cst_51 : f32 to vector<8x128xf32>
    %203 = arith.mulf %202, %201 : vector<8x128xf32>
    %cst_52 = arith.constant 5.000000e-01 : f32
    %204 = vector.broadcast %cst_52 : f32 to vector<8x128xf32>
    %205 = arith.addf %203, %204 : vector<8x128xf32>
    %206 = arith.select %16, %201, %205 : vector<8x128xi1>, vector<8x128xf32>
    %207 = vector.extract_strided_slice %206 {offsets = [0, 0], sizes = [8, 32], strides = [1, 1]} : vector<8x128xf32> to vector<8x32xf32>
    %208 = vector.extract_strided_slice %206 {offsets = [0, 32], sizes = [8, 32], strides = [1, 1]} : vector<8x128xf32> to vector<8x32xf32>
    %209 = vector.extract_strided_slice %206 {offsets = [0, 64], sizes = [8, 32], strides = [1, 1]} : vector<8x128xf32> to vector<8x32xf32>
    %210 = vector.extract_strided_slice %206 {offsets = [0, 96], sizes = [8, 32], strides = [1, 1]} : vector<8x128xf32> to vector<8x32xf32>
    %211 = arith.mulf %208, %175 : vector<8x32xf32>
    %212 = arith.mulf %207, %209 : vector<8x32xf32>
    %213 = arith.addf %211, %212 : vector<8x32xf32>
    %214 = math.tanh %213 : vector<8x32xf32>
    %215 = arith.mulf %210, %214 : vector<8x32xf32>
    %216 = vector.extract_strided_slice %196 {offsets = [0, 0], sizes = [8, 128], strides = [1, 1]} : vector<8x256xf32> to vector<8x128xf32>
    %217 = vector.extract_strided_slice %5 {offsets = [40, 0], sizes = [8, 128], strides = [1, 1]} : vector<64x128xf32> to vector<8x128xf32>
    %218 = arith.addf %216, %217 : vector<8x128xf32>
    %219 = math.tanh %218 : vector<8x128xf32>
    %cst_53 = arith.constant 5.000000e-01 : f32
    %220 = vector.broadcast %cst_53 : f32 to vector<8x128xf32>
    %221 = arith.mulf %220, %219 : vector<8x128xf32>
    %cst_54 = arith.constant 5.000000e-01 : f32
    %222 = vector.broadcast %cst_54 : f32 to vector<8x128xf32>
    %223 = arith.addf %221, %222 : vector<8x128xf32>
    %224 = arith.select %16, %219, %223 : vector<8x128xi1>, vector<8x128xf32>
    %225 = vector.extract_strided_slice %224 {offsets = [0, 0], sizes = [8, 32], strides = [1, 1]} : vector<8x128xf32> to vector<8x32xf32>
    %226 = vector.extract_strided_slice %224 {offsets = [0, 32], sizes = [8, 32], strides = [1, 1]} : vector<8x128xf32> to vector<8x32xf32>
    %227 = vector.extract_strided_slice %224 {offsets = [0, 64], sizes = [8, 32], strides = [1, 1]} : vector<8x128xf32> to vector<8x32xf32>
    %228 = vector.extract_strided_slice %224 {offsets = [0, 96], sizes = [8, 32], strides = [1, 1]} : vector<8x128xf32> to vector<8x32xf32>
    %229 = arith.mulf %226, %193 : vector<8x32xf32>
    %230 = arith.mulf %225, %227 : vector<8x32xf32>
    %231 = arith.addf %229, %230 : vector<8x32xf32>
    %232 = math.tanh %231 : vector<8x32xf32>
    %233 = arith.mulf %228, %232 : vector<8x32xf32>
    %cst_55 = arith.constant dense<0.000000e+00> : vector<8x256xf32>
    %234 = tpu.matmul %233, %6, %cst_55 {dimension_numbers = #tpu.dot_dimension_numbers<[1], [0], [0], [1], [0, 0, 1, 1], [], []>} : vector<8x32xf32>, vector<32x256xf32>, vector<8x256xf32> -> vector<8x256xf32>
    %cst_56 = arith.constant dense<0.000000e+00> : vector<8x128xf32>
    %235 = tpu.matmul %215, %7, %cst_56 {dimension_numbers = #tpu.dot_dimension_numbers<[1], [0], [0], [1], [0, 0, 1, 1], [], []>} : vector<8x32xf32>, vector<32x128xf32>, vector<8x128xf32> -> vector<8x128xf32>
    %236 = vector.extract_strided_slice %234 {offsets = [0, 128], sizes = [8, 128], strides = [1, 1]} : vector<8x256xf32> to vector<8x128xf32>
    %237 = arith.addf %236, %235 : vector<8x128xf32>
    %238 = arith.addf %237, %10 : vector<8x128xf32>
    %239 = math.tanh %238 : vector<8x128xf32>
    %cst_57 = arith.constant 5.000000e-01 : f32
    %240 = vector.broadcast %cst_57 : f32 to vector<8x128xf32>
    %241 = arith.mulf %240, %239 : vector<8x128xf32>
    %cst_58 = arith.constant 5.000000e-01 : f32
    %242 = vector.broadcast %cst_58 : f32 to vector<8x128xf32>
    %243 = arith.addf %241, %242 : vector<8x128xf32>
    %244 = arith.select %16, %239, %243 : vector<8x128xi1>, vector<8x128xf32>
    %245 = vector.extract_strided_slice %244 {offsets = [0, 0], sizes = [8, 32], strides = [1, 1]} : vector<8x128xf32> to vector<8x32xf32>
    %246 = vector.extract_strided_slice %244 {offsets = [0, 32], sizes = [8, 32], strides = [1, 1]} : vector<8x128xf32> to vector<8x32xf32>
    %247 = vector.extract_strided_slice %244 {offsets = [0, 64], sizes = [8, 32], strides = [1, 1]} : vector<8x128xf32> to vector<8x32xf32>
    %248 = vector.extract_strided_slice %244 {offsets = [0, 96], sizes = [8, 32], strides = [1, 1]} : vector<8x128xf32> to vector<8x32xf32>
    %249 = arith.mulf %246, %213 : vector<8x32xf32>
    %250 = arith.mulf %245, %247 : vector<8x32xf32>
    %251 = arith.addf %249, %250 : vector<8x32xf32>
    %252 = math.tanh %251 : vector<8x32xf32>
    %253 = arith.mulf %248, %252 : vector<8x32xf32>
    %254 = vector.extract_strided_slice %234 {offsets = [0, 0], sizes = [8, 128], strides = [1, 1]} : vector<8x256xf32> to vector<8x128xf32>
    %255 = vector.extract_strided_slice %5 {offsets = [48, 0], sizes = [8, 128], strides = [1, 1]} : vector<64x128xf32> to vector<8x128xf32>
    %256 = arith.addf %254, %255 : vector<8x128xf32>
    %257 = math.tanh %256 : vector<8x128xf32>
    %cst_59 = arith.constant 5.000000e-01 : f32
    %258 = vector.broadcast %cst_59 : f32 to vector<8x128xf32>
    %259 = arith.mulf %258, %257 : vector<8x128xf32>
    %cst_60 = arith.constant 5.000000e-01 : f32
    %260 = vector.broadcast %cst_60 : f32 to vector<8x128xf32>
    %261 = arith.addf %259, %260 : vector<8x128xf32>
    %262 = arith.select %16, %257, %261 : vector<8x128xi1>, vector<8x128xf32>
    %263 = vector.extract_strided_slice %262 {offsets = [0, 0], sizes = [8, 32], strides = [1, 1]} : vector<8x128xf32> to vector<8x32xf32>
    %264 = vector.extract_strided_slice %262 {offsets = [0, 32], sizes = [8, 32], strides = [1, 1]} : vector<8x128xf32> to vector<8x32xf32>
    %265 = vector.extract_strided_slice %262 {offsets = [0, 64], sizes = [8, 32], strides = [1, 1]} : vector<8x128xf32> to vector<8x32xf32>
    %266 = vector.extract_strided_slice %262 {offsets = [0, 96], sizes = [8, 32], strides = [1, 1]} : vector<8x128xf32> to vector<8x32xf32>
    %267 = arith.mulf %264, %231 : vector<8x32xf32>
    %268 = arith.mulf %263, %265 : vector<8x32xf32>
    %269 = arith.addf %267, %268 : vector<8x32xf32>
    %270 = math.tanh %269 : vector<8x32xf32>
    %271 = arith.mulf %266, %270 : vector<8x32xf32>
    %cst_61 = arith.constant dense<0.000000e+00> : vector<8x256xf32>
    %272 = tpu.matmul %271, %6, %cst_61 {dimension_numbers = #tpu.dot_dimension_numbers<[1], [0], [0], [1], [0, 0, 1, 1], [], []>} : vector<8x32xf32>, vector<32x256xf32>, vector<8x256xf32> -> vector<8x256xf32>
    %cst_62 = arith.constant dense<0.000000e+00> : vector<8x128xf32>
    %273 = tpu.matmul %253, %7, %cst_62 {dimension_numbers = #tpu.dot_dimension_numbers<[1], [0], [0], [1], [0, 0, 1, 1], [], []>} : vector<8x32xf32>, vector<32x128xf32>, vector<8x128xf32> -> vector<8x128xf32>
    %274 = vector.extract_strided_slice %272 {offsets = [0, 128], sizes = [8, 128], strides = [1, 1]} : vector<8x256xf32> to vector<8x128xf32>
    %275 = arith.addf %274, %273 : vector<8x128xf32>
    %276 = arith.addf %275, %10 : vector<8x128xf32>
    %277 = math.tanh %276 : vector<8x128xf32>
    %cst_63 = arith.constant 5.000000e-01 : f32
    %278 = vector.broadcast %cst_63 : f32 to vector<8x128xf32>
    %279 = arith.mulf %278, %277 : vector<8x128xf32>
    %cst_64 = arith.constant 5.000000e-01 : f32
    %280 = vector.broadcast %cst_64 : f32 to vector<8x128xf32>
    %281 = arith.addf %279, %280 : vector<8x128xf32>
    %282 = arith.select %16, %277, %281 : vector<8x128xi1>, vector<8x128xf32>
    %283 = vector.extract_strided_slice %282 {offsets = [0, 0], sizes = [8, 32], strides = [1, 1]} : vector<8x128xf32> to vector<8x32xf32>
    %284 = vector.extract_strided_slice %282 {offsets = [0, 32], sizes = [8, 32], strides = [1, 1]} : vector<8x128xf32> to vector<8x32xf32>
    %285 = vector.extract_strided_slice %282 {offsets = [0, 64], sizes = [8, 32], strides = [1, 1]} : vector<8x128xf32> to vector<8x32xf32>
    %286 = vector.extract_strided_slice %282 {offsets = [0, 96], sizes = [8, 32], strides = [1, 1]} : vector<8x128xf32> to vector<8x32xf32>
    %287 = arith.mulf %284, %251 : vector<8x32xf32>
    %288 = arith.mulf %283, %285 : vector<8x32xf32>
    %289 = arith.addf %287, %288 : vector<8x32xf32>
    %290 = math.tanh %289 : vector<8x32xf32>
    %291 = arith.mulf %286, %290 : vector<8x32xf32>
    %292 = vector.extract_strided_slice %272 {offsets = [0, 0], sizes = [8, 128], strides = [1, 1]} : vector<8x256xf32> to vector<8x128xf32>
    %293 = vector.extract_strided_slice %5 {offsets = [56, 0], sizes = [8, 128], strides = [1, 1]} : vector<64x128xf32> to vector<8x128xf32>
    %294 = arith.addf %292, %293 : vector<8x128xf32>
    %295 = math.tanh %294 : vector<8x128xf32>
    %cst_65 = arith.constant 5.000000e-01 : f32
    %296 = vector.broadcast %cst_65 : f32 to vector<8x128xf32>
    %297 = arith.mulf %296, %295 : vector<8x128xf32>
    %cst_66 = arith.constant 5.000000e-01 : f32
    %298 = vector.broadcast %cst_66 : f32 to vector<8x128xf32>
    %299 = arith.addf %297, %298 : vector<8x128xf32>
    %300 = arith.select %16, %295, %299 : vector<8x128xi1>, vector<8x128xf32>
    %301 = vector.extract_strided_slice %300 {offsets = [0, 0], sizes = [8, 32], strides = [1, 1]} : vector<8x128xf32> to vector<8x32xf32>
    %302 = vector.extract_strided_slice %300 {offsets = [0, 32], sizes = [8, 32], strides = [1, 1]} : vector<8x128xf32> to vector<8x32xf32>
    %303 = vector.extract_strided_slice %300 {offsets = [0, 64], sizes = [8, 32], strides = [1, 1]} : vector<8x128xf32> to vector<8x32xf32>
    %304 = vector.extract_strided_slice %300 {offsets = [0, 96], sizes = [8, 32], strides = [1, 1]} : vector<8x128xf32> to vector<8x32xf32>
    %305 = arith.mulf %302, %269 : vector<8x32xf32>
    %306 = arith.mulf %301, %303 : vector<8x32xf32>
    %307 = arith.addf %305, %306 : vector<8x32xf32>
    %308 = math.tanh %307 : vector<8x32xf32>
    %309 = arith.mulf %304, %308 : vector<8x32xf32>
    %cst_67 = arith.constant dense<0.000000e+00> : vector<8x256xf32>
    %310 = tpu.matmul %309, %6, %cst_67 {dimension_numbers = #tpu.dot_dimension_numbers<[1], [0], [0], [1], [0, 0, 1, 1], [], []>} : vector<8x32xf32>, vector<32x256xf32>, vector<8x256xf32> -> vector<8x256xf32>
    %cst_68 = arith.constant dense<0.000000e+00> : vector<8x128xf32>
    %311 = tpu.matmul %291, %7, %cst_68 {dimension_numbers = #tpu.dot_dimension_numbers<[1], [0], [0], [1], [0, 0, 1, 1], [], []>} : vector<8x32xf32>, vector<32x128xf32>, vector<8x128xf32> -> vector<8x128xf32>
    %312 = vector.extract_strided_slice %310 {offsets = [0, 128], sizes = [8, 128], strides = [1, 1]} : vector<8x256xf32> to vector<8x128xf32>
    %313 = arith.addf %312, %311 : vector<8x128xf32>
    %314 = arith.addf %313, %10 : vector<8x128xf32>
    %315 = math.tanh %314 : vector<8x128xf32>
    %cst_69 = arith.constant 5.000000e-01 : f32
    %316 = vector.broadcast %cst_69 : f32 to vector<8x128xf32>
    %317 = arith.mulf %316, %315 : vector<8x128xf32>
    %cst_70 = arith.constant 5.000000e-01 : f32
    %318 = vector.broadcast %cst_70 : f32 to vector<8x128xf32>
    %319 = arith.addf %317, %318 : vector<8x128xf32>
    %320 = arith.select %16, %315, %319 : vector<8x128xi1>, vector<8x128xf32>
    %321 = vector.extract_strided_slice %320 {offsets = [0, 0], sizes = [8, 32], strides = [1, 1]} : vector<8x128xf32> to vector<8x32xf32>
    %322 = vector.extract_strided_slice %320 {offsets = [0, 32], sizes = [8, 32], strides = [1, 1]} : vector<8x128xf32> to vector<8x32xf32>
    %323 = vector.extract_strided_slice %320 {offsets = [0, 64], sizes = [8, 32], strides = [1, 1]} : vector<8x128xf32> to vector<8x32xf32>
    %324 = vector.extract_strided_slice %320 {offsets = [0, 96], sizes = [8, 32], strides = [1, 1]} : vector<8x128xf32> to vector<8x32xf32>
    %325 = arith.mulf %322, %289 : vector<8x32xf32>
    %326 = arith.mulf %321, %323 : vector<8x32xf32>
    %327 = arith.addf %325, %326 : vector<8x32xf32>
    %328 = math.tanh %327 : vector<8x32xf32>
    %329 = arith.mulf %324, %328 : vector<8x32xf32>
    %c0_71 = arith.constant 0 : index
    %c0_72 = arith.constant 0 : index
    %c0_73 = arith.constant 0 : index
    %330 = vector.load %arg11[%c0_71, %c0_72, %c0_73] : memref<2x8x32xf32, #tpu.memory_space<vmem>>, vector<1x8x32xf32>
    %331 = vector.shape_cast %330 : vector<1x8x32xf32> to vector<8x32xf32>
    %332 = vector.shape_cast %309 : vector<8x32xf32> to vector<1x8x32xf32>
    tpu.vector_store %arg11[%c0_71, %c0_72, %c0_73], %332 {strides = array<i32>} : memref<2x8x32xf32, #tpu.memory_space<vmem>>, vector<1x8x32xf32>,
    %c1_74 = arith.constant 1 : index
    %c0_75 = arith.constant 0 : index
    %c0_76 = arith.constant 0 : index
    %333 = vector.load %arg11[%c1_74, %c0_75, %c0_76] : memref<2x8x32xf32, #tpu.memory_space<vmem>>, vector<1x8x32xf32>
    %334 = vector.shape_cast %333 : vector<1x8x32xf32> to vector<8x32xf32>
    %335 = vector.shape_cast %329 : vector<8x32xf32> to vector<1x8x32xf32>
    tpu.vector_store %arg11[%c1_74, %c0_75, %c0_76], %335 {strides = array<i32>} : memref<2x8x32xf32, #tpu.memory_space<vmem>>, vector<1x8x32xf32>,
    %c0_77 = arith.constant 0 : index
    %c0_78 = arith.constant 0 : index
    %c0_79 = arith.constant 0 : index
    %336 = vector.load %arg12[%c0_77, %c0_78, %c0_79] : memref<2x8x32xf32, #tpu.memory_space<vmem>>, vector<1x8x32xf32>
    %337 = vector.shape_cast %336 : vector<1x8x32xf32> to vector<8x32xf32>
    %338 = vector.shape_cast %307 : vector<8x32xf32> to vector<1x8x32xf32>
    tpu.vector_store %arg12[%c0_77, %c0_78, %c0_79], %338 {strides = array<i32>} : memref<2x8x32xf32, #tpu.memory_space<vmem>>, vector<1x8x32xf32>,
    %c1_80 = arith.constant 1 : index
    %c0_81 = arith.constant 0 : index
    %c0_82 = arith.constant 0 : index
    %339 = vector.load %arg12[%c1_80, %c0_81, %c0_82] : memref<2x8x32xf32, #tpu.memory_space<vmem>>, vector<1x8x32xf32>
    %340 = vector.shape_cast %339 : vector<1x8x32xf32> to vector<8x32xf32>
    %341 = vector.shape_cast %327 : vector<8x32xf32> to vector<1x8x32xf32>
    tpu.vector_store %arg12[%c1_80, %c0_81, %c0_82], %341 {strides = array<i32>} : memref<2x8x32xf32, #tpu.memory_space<vmem>>, vector<1x8x32xf32>,
    %c0_83 = arith.constant 0 : index
    %c0_84 = arith.constant 0 : index
    %342 = vector.load %arg8[%c0_83, %c0_84] : memref<32x8xf32, #tpu.memory_space<vmem>>, vector<32x8xf32>
    %cst_85 = arith.constant dense<0.000000e+00> : vector<8x8xf32>
    %343 = tpu.matmul %329, %342, %cst_85 {dimension_numbers = #tpu.dot_dimension_numbers<[1], [0], [0], [1], [0, 0, 1, 1], [], []>} : vector<8x32xf32>, vector<32x8xf32>, vector<8x8xf32> -> vector<8x8xf32>
    %c0_86 = arith.constant 0 : index
    %c0_87 = arith.constant 0 : index
    %344 = vector.load %arg9[%c0_86, %c0_87] : memref<1x8xf32, #tpu.memory_space<vmem>>, vector<1x8xf32>
    %345 = vector.broadcast %344 : vector<1x8xf32> to vector<8x8xf32>
    %346 = arith.addf %343, %345 : vector<8x8xf32>
    %cst_88 = arith.constant dense<0xFF800000> : vector<8xf32>
    %347 = vector.multi_reduction <maximumf>, %346, %cst_88 [1] : vector<8x8xf32> to vector<8xf32>
    %348 = vector.shape_cast %347 : vector<8xf32> to vector<8x1xf32>
    %349 = vector.broadcast %348 : vector<8x1xf32> to vector<8x8xf32>
    %350 = arith.subf %346, %349 : vector<8x8xf32>
    %351 = math.exp %350 : vector<8x8xf32>
    %cst_89 = arith.constant dense<0.000000e+00> : vector<8xf32>
    %352 = vector.multi_reduction <add>, %351, %cst_89 [1] : vector<8x8xf32> to vector<8xf32>
    %353 = vector.shape_cast %352 : vector<8xf32> to vector<8x1xf32>
    %354 = math.log %353 : vector<8x1xf32>
    %355 = vector.broadcast %354 : vector<8x1xf32> to vector<8x8xf32>
    %356 = arith.subf %350, %355 : vector<8x8xf32>
    %c0_90 = arith.constant 0 : index
    %c0_91 = arith.constant 0 : index
    %357 = vector.load %arg10[%c0_90, %c0_91] : memref<8x8xf32, #tpu.memory_space<vmem>>, vector<8x8xf32>
    tpu.vector_store %arg10[%c0_90, %c0_91], %356 {strides = array<i32>} : memref<8x8xf32, #tpu.memory_space<vmem>>, vector<8x8xf32>,
    return
  }
}

</mosaic_0001>

<bundles_post_ra>
// kernel: tpu_custom_call.1
= control target key start
LH: loop header
LB: loop body
LE: loop exit
PB: predicated region body
PF: predicated region fallthrough
CT: control target
= control target key end

     0   :  { %18 = vsyncpa [#allocation3], 0  ;;  %s3064_s0 = inlined_call_operand.vmem [shape: f32[64,16], index: 0, kind: input, shape index: {}]   ;;  %s3065_s1 = inlined_call_operand.vmem [shape: f32[2,8,32], index: 1, kind: input, shape index: {}]   ;;  %s3066_s2 = inlined_call_operand.hbm [shape: f32[2,8,32], index: 2, kind: input, shape index: {}]   ;;  %s3067_s3 = inlined_call_operand.vmem [shape: f32[16,128], index: 3, kind: input, shape index: {}]   ;;  %s3068_s4 = inlined_call_operand.vmem [shape: f32[1,128], index: 4, kind: input, shape index: {}]   ;;  %s3069_s5 = inlined_call_operand.vmem [shape: f32[32,256], index: 5, kind: input, shape index: {}]   ;;  %s3070_s6 = inlined_call_operand.vmem [shape: f32[32,128], index: 6, kind: input, shape index: {}]   ;;  %s3071_s7 = inlined_call_operand.vmem [shape: f32[1,128], index: 7, kind: input, shape index: {}]   ;;  %s3072_s8 = inlined_call_operand.vmem [shape: f32[32,8], index: 8, kind: input, shape index: {}]   ;;  %s3073_s9 = inlined_call_operand.vmem [shape: f32[1,8], index: 9, kind: input, shape index: {}]   ;;  %s3074_s10 = inlined_call_operand.hbm [shape: f32[8,8], index: 10, kind: output, shape index: {0}]   ;;  %s3075_s11 = inlined_call_operand.hbm [shape: f32[2,8,32], index: 11, kind: output, shape index: {1}]   ;;  %s3076_s12 = inlined_call_operand.hbm [shape: f32[2,8,32], index: 12, kind: output, shape index: {2}]  }
   0x1   :  { %19 = vsyncpa [#allocation4], 0 }
   0x2   :  { %20 = vsyncpa [#allocation7], 0  ;;  %s2544_s21 = smov [#allocation2]   ;;  %s2450_s25 = scalar_lea.hbm %s3066_s2, 256 }
   0x3   :  { %s30_s22 = sshll.u32 %s2544_s21, 4  ;;  %p2451_p0 = scmp.ne.s32.totalorder %s3066_s2, %s2450_s25  ;;  %s31_s22 = int_to_ptr.vmem [resolvable:$true] %s30_s22 }
   0x4   :  { %p2454_p1 = scmp.lt.u32.totalorder %s2450_s25, %s3066_s2 }
   0x6   :  { %p2456_p2 = pnand %p2454_p1, %p2451_p0 }
   0x8   :  { %2459 = shalt.err (!%p2456_p2)
}
   0x9   :  { %s2460_s30 = scalar_lea.vmem %s31_s22, 256  ;;  %p2465_p4 = scmp.lt.s32.totalorder %s31_s22, %s31_s22 }
   0xa   :  { %p2461_p3 = scmp.ne.s32.totalorder %s31_s22, %s2460_s30  ;;  %p2466_p5 = scmp.lt.s32.totalorder %s2460_s30, %s2460_s30 }
   0xc   :  { %p2467_p6 = por %p2466_p5, %p2465_p4 }
   0xe   :  { %p2468_p7 = pnand %p2467_p6, %p2461_p3 }
  0x10   :  { %2471 = shalt.err (!%p2468_p7)
}
  0x11   :  { %s2545_s13 = smov 128   ;;  %s2546_s14 = smov 8  }
  0x12   :  { %36 = dma.hbm_to_vmem [thread:$0]  %s3066_s2, 256, %s31_s22, [#allocation3], %s2545_s13, %s2545_s13, %s2546_s14  }
  0x13   :  { %2538 = dma.done.wait [#allocation3], 256  }
  0x14   :  { %2539 = vsyncadd [#allocation3], 4294967040  ;;  %v2547_v0 = vmov 0.0   ;;  %v62_v1 = vld [vmem:[%s3067_s3] sm:$0xff]  ;;  %v63_v2 = vld [vmem:[%s3067_s3 + $0x8] sm:$0xff]  ;;  %vm71_vm0 = vcmask 130048   ;;  %v220_v26 = vlaneseq }
  0x15   :  { %299 = vmatprep.mubr.f32.mxu1 %v2547_v0  ;;  %v202_v3 = vld [vmem:[%s3069_s5 + $0x8] sm:$0xff]  ;;  %v2240_v4 = vpack.c.bf16 %v63_v2, %v62_v1  ;;  %v204_v5 = vld [vmem:[%s3069_s5 + $0x18] sm:$0xff]  ;;  %v201_v6 = vld [vmem:[%s3069_s5] sm:$0xff]  ;;  %vm231_vm1 = vcmask 261120   ;;  %s2549_s25 = smov 32   ;;  %v2550_v43 = vmov 0.0|0.0  }
  0x16   :  { %v203_v7 = vld [vmem:[%s3069_s5 + $0x10] sm:$0xff]  ;;  %v2655_v8 = vpack.c.bf16 %v204_v5, %v202_v3  ;;  %v54_v10 = vld [vmem:[%s3064_s0] sm:$0xff]  ;;  %v206_v11 = vld [vmem:[%s3069_s5 + $0x28] sm:$0xff]  ;;  %v221_v27 = vand.u32 127, %v220_v26  ;;  %vm2551_vm5 = vmmov 0   ;;  %vm1980_vm6 = vcmask 64512  }
  0x17   :  { %v2657_v9 = vpack.c.bf16 %v203_v7, %v201_v6  ;;  %2241 = vmatprep.subr.bf16.mxu0 %v2240_v4  ;;  %2129 = vmatprep.mubr.msk.f32.mxu0 %vm71_vm0, %v54_v10  ;;  %v208_v12 = vld [vmem:[%s3069_s5 + $0x38] sm:$0xff]  ;;  %v205_v13 = vld [vmem:[%s3069_s5 + $0x20] sm:$0xff]  ;;  %v207_v14 = vld [vmem:[%s3069_s5 + $0x30] sm:$0xff] }
  0x18   :  { %2245 = vmatprep.subr.bf16.mxu1 %v2655_v8  ;;  %2243 = vmatpush3.bf16.msra.mxu0 %v2240_v4  ;;  %v55_v15 = vld [vmem:[%s3064_s0 + $0x8] sm:$0xff]  ;;  %v2679_v16 = vpack.c.bf16 %v208_v12, %v206_v11  ;;  %v2682_v17 = vpack.c.bf16 %v207_v14, %v205_v13  ;;  %v225_v18 = vld [vmem:[%s3065_s1] sm:$0xff]  ;;  %vm222_vm2 = vcmp.ge.s32.totalorder %v221_v27, 64  ;;  %vm223_vm3 = vcmp.lt.s32.totalorder %v221_v27, 96  ;;  %v56_v42 = vld [vmem:[%s3064_s0 + $0x10] sm:$0xff] }
  0x19   :  { %2247 = vmatpush1.bf16.msra.mxu1 %v2657_v9  ;;  %v2700_v19 = vld [vmem:[%s3068_s4] ss:$0 sm:$0xff]  ;;  %vm2705_vm4 = vmand %vm222_vm2, %vm223_vm3  ;;  %s2548_s4 = smov 64   ;;  %v210_v41 = vld [vmem:[%s3070_s6 + $0x8] sm:$0xff]  ;;  %2260 = vmatprep.subr.bf16.mxu0 %v2550_v43 }
  0x1a   :  { %2249 = vmatprep.subr.bf16.mxu1 %v2679_v16  ;;  %v226_v33 = vld [vmem:[#allocation2] sm:$0xff]  ;;  %v57_v45 = vld [vmem:[%s3064_s0 + $0x18] sm:$0xff]  ;;  %v211_v47 = vld [vmem:[%s3070_s6 + $0x10] sm:$0xff] }
  0x1b   :  { %2130 = vmatmul.mubr.msk.f32.vlgmr.msra.gmra.mrb[0].mxu0 %vm71_vm0, %v55_v15  ;;  %v209_v40 = vld [vmem:[%s3070_s6] sm:$0xff]  ;;  %v212_v48 = vld [vmem:[%s3070_s6 + $0x18] sm:$0xff]  ;;  %v59_v49 = vld [vmem:[%s3064_s0 + $0x28] sm:$0xff] }
  0x1c   :  { %v2727_v44 = vpack.c.bf16 %v210_v41, %v209_v40  ;;  %2132 = vmatprep.mubr.msk.f32.mxu0 %vm71_vm0, %v56_v42  ;;  %v58_v46 = vld [vmem:[%s3064_s0 + $0x20] sm:$0xff]  ;;  %v2748_v50 = vpack.c.bf16 %v212_v48, %v211_v47  ;;  %v60_v51 = vld [vmem:[%s3064_s0 + $0x30] sm:$0xff]  ;;  %v61_v52 = vld [vmem:[%s3064_s0 + $0x38] sm:$0xff] }
  0x1d   :  { %2251 = vmatpush1.bf16.msra.mxu1 %v2682_v17  ;;  %v2050_v54 = vld [vmem:[%s3065_s1 + $0x8] sm:$0xff]  ;;  %v2799_v6 = vld [vmem:[%s3071_s7] ss:$0 sm:$0xff]  ;;  %v1899_v30 = vld [vmem:[%s3072_s8 + $0x10] sm:$0xff] }
  0x1e   :  { %2253 = vmatprep.subr.bf16.mxu1 %v2655_v8  ;;  %2262 = vmatpush3.bf16.msra.mxu0 %v2727_v44 }
  0x1f   :  { %2133 = vmatmul.mubr.msk.f32.gmra.mrb[2].mxu0 %vm71_vm0, %v57_v45  ;;  %2263 = vmatprep.subr.bf16.mxu0 %v2550_v43 }
  0x20   :  { %2051 = vmatmul.mubr.msk.f32.vlgmr.msra.gmra.mrb[0].mxu1 %vm231_vm1, %v225_v18  ;;  %2135 = vmatprep.mubr.msk.f32.mxu0 %vm71_vm0, %v58_v46 }
  0x21   :  { %2255 = vmatpush1.bf16.msra.mxu1 %v2657_v9  ;;  %400 = vmatprep.mubr.f32.mxu1 %v2547_v0 }
  0x22   :  { %2257 = vmatprep.subr.bf16.mxu1 %v2679_v16  ;;  %2265 = vmatpush3.bf16.msra.mxu0 %v2748_v50 }
  0x23   :  { %2136 = vmatmul.mubr.msk.f32.gmra.mrb[4].mxu0 %vm71_vm0, %v59_v49  ;;  %2274 = vmatprep.subr.bf16.mxu0 %v2550_v43 }
  0x24   :  { %2138 = vmatprep.mubr.msk.f32.mxu0 %vm71_vm0, %v60_v51 }
  0x25   :  { %2259 = vmatpush1.bf16.msra.mxu1 %v2682_v17 }
  0x26   :  { %2267 = vmatprep.subr.bf16.mxu1 %v2655_v8 }
  0x27   :  { %2139 = vmatmul.mubr.msk.f32.gmra.mrb[6].mxu0 %vm71_vm0, %v61_v52 }
  0x28   :  { %2149 = vmatprep.mubr.msk.f32.mxu0 %vm2551_vm5, %v2547_v0 }
  0x2b   :  { %2150 = vmatmul.mubr.msk.f32.vlgmr.msra.gmra.mrb[8].mxu0 %vm231_vm1, %v2050_v54 }
  0x2c   :  { %2276 = vmatpush3.bf16.msra.mxu0 %v2727_v44  ;;  %2160 = vmatprep.mubr.msk.f32.mxu0 %vm2551_vm5, %v2547_v0 }
  0x2d   :  { %2277 = vmatprep.subr.bf16.mxu0 %v2550_v43 }
  0x30   :  { %2279 = vmatpush3.bf16.msra.mxu0 %v2748_v50 }
  0x31   :  { %2288 = vmatprep.subr.bf16.mxu0 %v2550_v43 }
  0xee   :  { %v2702_v20 = vpop.f32.mrb[0].mxu0 }
  0xef   :  { %v162_v21 = vpop.f32.mrb[1].mxu0  ;;  %v168_v3 = vadd.f32 %v2702_v20, %v2700_v19 }
  0xf0   :  { %v163_v22 = vadd.f32 %v2700_v19, %v162_v21 }
  0xf2   :  { %v2776_v57 = vpop.f32.mrb[2].mxu0 }
  0xf3   :  { %v301_v23 = vpop.f32.mrb[0].mxu1  ;;  %v2778_v58 = vpop.f32.mrb[3].mxu0 }
  0xf4   :  { %v305_v24 = vadd.f32 %v301_v23, %v163_v22  ;;  %v303_v25 = vpop.f32.mrb[1].mxu1  ;;  %v230_v22 = vld [vmem:[#allocation2 + $0x8] sm:$0xff]  ;;  %v173_v46 = vadd.f32 %v2700_v19, %v2778_v58 }
  0xf6   :  { %2382 = vtanh.f32 %v305_v24  ;;  %v2780_v59 = vpop.f32.mrb[4].mxu0 }
  0xf7   :  { %v2782_v60 = vpop.f32.mrb[5].mxu0 }
  0xfa   :  { %v2784_v61 = vpop.f32.mrb[6].mxu0 }
  0xfb   :  { %v2786_v62 = vpop.f32.mrb[7].mxu0 }
  0xfe   :  { %v476_v1 = vpop.f32.mrb[8].mxu0 }
  0xff   :  { %v2151_v2 = vpop.f32.mrb[9].mxu0 }
 0x100   :  { %v2383_v28 = vpop.eup %2382 }
 0x101   :  { %v307_v29 = vmul.f32 0.5, %v2383_v28 }
 0x103   :  { %v308_v31 = vadd.f32 0.5, %v307_v29 }
 0x105   :  { %v309_v32 = vsel %vm2705_vm4, %v2383_v28, %v308_v31 }
 0x106   :  { %316 = vrot.lane.b32.xlu0 %v309_v32, %s2548_s4 }
 0x10a   :  { %311 = vrot.lane.b32.xlu0 %v226_v33, %s2549_s25 }
 0x178   :  { %v317_v34 = vpop.permute.xlu0 %316 }
 0x179   :  { %v319_v35 = vmul.f32 %v317_v34, %v309_v32 }
 0x17b   :  { %321 = vrot.lane.b32.xlu1 %v319_v35, %s2549_s25 }
 0x17c   :  { %v312_v36 = vpop.permute.xlu0 %311 }
 0x17d   :  { %v314_v37 = vmul.f32 %v312_v36, %v309_v32 }
 0x1ed   :  { %v322_v38 = vpop.permute.xlu1 %321 }
 0x1ee   :  { %v2714_v39 = vadd.f32 %v322_v38, %v314_v37 }
 0x1f0   :  { %2384 = vtanh.f32 %v2714_v39 }
 0x1fa   :  { %v2385_v53 = vpop.eup %2384 }
 0x1fb   :  { %327 = vrot.lane.b32.xlu1 %v2385_v53, %s2548_s4 }
 0x26d   :  { %v328_v55 = vpop.permute.xlu1 %327 }
 0x26e   :  { %v330_v56 = vmul.f32 %v328_v55, %v309_v32 }
 0x270   :  { %332 = vrot.lane.b32.xlu0 %v330_v56, %s2549_s25 }
 0x2e2   :  { %v333_v63 = vpop.permute.xlu0 %332 }
 0x2e3   :  { %2052 = vmatmul.mubr.msk.f32.vlgmr.msra.gmra.mrb[2].mxu1 %vm231_vm1, %v333_v63 }
 0x2e4   :  { %2269 = vmatpush1.bf16.msra.mxu1 %v2657_v9  ;;  %598 = vmatprep.mubr.f32.mxu1 %v2547_v0 }
 0x2e5   :  { %2271 = vmatprep.subr.bf16.mxu1 %v2679_v16 }
 0x2e8   :  { %2273 = vmatpush1.bf16.msra.mxu1 %v2682_v17 }
 0x2e9   :  { %2281 = vmatprep.subr.bf16.mxu1 %v2655_v8 }
 0x3b6   :  { %v402_v4 = vpop.f32.mrb[2].mxu1 }
 0x3b7   :  { %v507_v5 = vadd.f32 %v402_v4, %v168_v3  ;;  %v404_v7 = vpop.f32.mrb[3].mxu1 }
 0x3b8   :  { %v480_v10 = vadd.f32 %v476_v1, %v404_v7 }
 0x3b9   :  { %2386 = vtanh.f32 %v507_v5 }
 0x3ba   :  { %v481_v11 = vadd.f32 %v2799_v6, %v480_v10 }
 0x3bc   :  { %2388 = vtanh.f32 %v481_v11 }
 0x3c3   :  { %v2387_v12 = vpop.eup %2386 }
 0x3c4   :  { %v509_v13 = vmul.f32 0.5, %v2387_v12 }
 0x3c6   :  { %v2389_v14 = vpop.eup %2388  ;;  %v510_v15 = vadd.f32 0.5, %v509_v13 }
 0x3c7   :  { %v483_v18 = vmul.f32 0.5, %v2389_v14 }
 0x3c8   :  { %v511_v20 = vsel %vm2705_vm4, %v2387_v12, %v510_v15 }
 0x3c9   :  { %514 = vrot.lane.b32.xlu1 %v511_v20, %s2548_s4  ;;  %v484_v21 = vadd.f32 0.5, %v483_v18  ;;  %v512_v29 = vmul.f32 %v511_v20, %v2714_v39 }
 0x3cb   :  { %v485_v23 = vsel %vm2705_vm4, %v2389_v14, %v484_v21 }
 0x3cc   :  { %492 = vrot.lane.b32.xlu0 %v485_v23, %s2548_s4 }
 0x3cd   :  { %487 = vrot.lane.b32.xlu1 %v230_v22, %s2549_s25 }
 0x43b   :  { %v515_v24 = vpop.permute.xlu1 %514 }
 0x43c   :  { %v517_v25 = vmul.f32 %v515_v24, %v511_v20 }
 0x43e   :  { %519 = vrot.lane.b32.xlu0 %v517_v25, %s2549_s25  ;;  %v493_v26 = vpop.permute.xlu0 %492 }
 0x43f   :  { %v495_v27 = vmul.f32 %v493_v26, %v485_v23  ;;  %v488_v28 = vpop.permute.xlu1 %487 }
 0x440   :  { %v490_v33 = vmul.f32 %v488_v28, %v485_v23 }
 0x441   :  { %497 = vrot.lane.b32.xlu1 %v495_v27, %s2549_s25 }
 0x4b0   :  { %v520_v31 = vpop.permute.xlu0 %519 }
 0x4b1   :  { %v522_v32 = vadd.f32 %v520_v31, %v512_v29  ;;  %v178_v29 = vadd.f32 %v2776_v57, %v2700_v19 }
 0x4b3   :  { %2390 = vtanh.f32 %v522_v32  ;;  %v498_v34 = vpop.permute.xlu1 %497 }
 0x4b4   :  { %v500_v35 = vadd.f32 %v498_v34, %v490_v33 }
 0x4b6   :  { %2392 = vtanh.f32 %v500_v35 }
 0x4bd   :  { %v2391_v36 = vpop.eup %2390 }
 0x4be   :  { %525 = vrot.lane.b32.xlu0 %v2391_v36, %s2548_s4 }
 0x4c0   :  { %v2393_v37 = vpop.eup %2392 }
 0x4c1   :  { %503 = vrot.lane.b32.xlu1 %v2393_v37, %s2548_s4 }
 0x530   :  { %v526_v38 = vpop.permute.xlu0 %525 }
 0x531   :  { %v528_v40 = vmul.f32 %v526_v38, %v511_v20 }
 0x533   :  { %530 = vrot.lane.b32.xlu0 %v528_v40, %s2549_s25  ;;  %v504_v41 = vpop.permute.xlu1 %503 }
 0x534   :  { %v506_v42 = vmul.f32 %v504_v41, %v485_v23 }
 0x536   :  { %606 = vrot.lane.b32.xlu1 %v506_v42, %s2549_s25 }
 0x5a5   :  { %v531_v39 = vpop.permute.xlu0 %530 }
 0x5a6   :  { %2054 = vmatmul.mubr.msk.f32.vlgmr.msra.gmra.mrb[4].mxu1 %vm231_vm1, %v531_v39 }
 0x5a7   :  { %2283 = vmatpush1.bf16.msra.mxu1 %v2657_v9  ;;  %794 = vmatprep.mubr.f32.mxu1 %v2547_v0 }
 0x5a8   :  { %v607_v45 = vpop.permute.xlu1 %606  ;;  %2285 = vmatprep.subr.bf16.mxu1 %v2679_v16 }
 0x5a9   :  { %2161 = vmatmul.mubr.msk.f32.vlgmr.msra.gmra.mrb[10].mxu0 %vm231_vm1, %v607_v45 }
 0x5aa   :  { %2290 = vmatpush3.bf16.msra.mxu0 %v2727_v44  ;;  %2171 = vmatprep.mubr.msk.f32.mxu0 %vm2551_vm5, %v2547_v0 }
 0x5ab   :  { %2287 = vmatpush1.bf16.msra.mxu1 %v2682_v17  ;;  %2291 = vmatprep.subr.bf16.mxu0 %v2550_v43 }
 0x5ac   :  { %2295 = vmatprep.subr.bf16.mxu1 %v2655_v8 }
 0x5ae   :  { %2293 = vmatpush3.bf16.msra.mxu0 %v2748_v50 }
 0x5af   :  { %2302 = vmatprep.subr.bf16.mxu0 %v2550_v43 }
 0x679   :  { %v600_v47 = vpop.f32.mrb[4].mxu1 }
 0x67a   :  { %v703_v48 = vadd.f32 %v600_v47, %v173_v46  ;;  %v602_v49 = vpop.f32.mrb[5].mxu1 }
 0x67c   :  { %2394 = vtanh.f32 %v703_v48  ;;  %v676_v51 = vpop.f32.mrb[10].mxu0 }
 0x67d   :  { %v680_v52 = vadd.f32 %v676_v51, %v602_v49  ;;  %v2162_v53 = vpop.f32.mrb[11].mxu0 }
 0x67f   :  { %v681_v54 = vadd.f32 %v2799_v6, %v680_v52 }
 0x681   :  { %2396 = vtanh.f32 %v681_v54 }
 0x686   :  { %v2395_v55 = vpop.eup %2394 }
 0x687   :  { %v705_v56 = vmul.f32 0.5, %v2395_v55 }
 0x689   :  { %v706_v63 = vadd.f32 0.5, %v705_v56 }
 0x68b   :  { %v2397_v1 = vpop.eup %2396  ;;  %v707_v2 = vsel %vm2705_vm4, %v2395_v55, %v706_v63 }
 0x68c   :  { %710 = vrot.lane.b32.xlu0 %v707_v2, %s2548_s4  ;;  %v683_v58 = vmul.f32 0.5, %v2397_v1  ;;  %v708_v12 = vmul.f32 %v707_v2, %v522_v32 }
 0x68e   :  { %v684_v3 = vadd.f32 0.5, %v683_v58 }
 0x690   :  { %v685_v4 = vsel %vm2705_vm4, %v2397_v1, %v684_v3 }
 0x691   :  { %688 = vrot.lane.b32.xlu1 %v685_v4, %s2548_s4  ;;  %v686_v15 = vmul.f32 %v685_v4, %v500_v35 }
 0x6fe   :  { %v711_v5 = vpop.permute.xlu0 %710 }
 0x6ff   :  { %v713_v7 = vmul.f32 %v711_v5, %v707_v2 }
 0x701   :  { %715 = vrot.lane.b32.xlu0 %v713_v7, %s2549_s25 }
 0x703   :  { %v689_v10 = vpop.permute.xlu1 %688 }
 0x704   :  { %v691_v11 = vmul.f32 %v689_v10, %v685_v4 }
 0x706   :  { %693 = vrot.lane.b32.xlu1 %v691_v11, %s2549_s25  ;;  %v183_v11 = vadd.f32 %v2700_v19, %v2782_v60 }
 0x773   :  { %v716_v13 = vpop.permute.xlu0 %715 }
 0x774   :  { %v718_v14 = vadd.f32 %v716_v13, %v708_v12 }
 0x776   :  { %2398 = vtanh.f32 %v718_v14 }
 0x778   :  { %v694_v18 = vpop.permute.xlu1 %693 }
 0x779   :  { %v696_v20 = vadd.f32 %v694_v18, %v686_v15 }
 0x77b   :  { %2400 = vtanh.f32 %v696_v20 }
 0x780   :  { %v2399_v21 = vpop.eup %2398 }
 0x781   :  { %721 = vrot.lane.b32.xlu0 %v2399_v21, %s2548_s4 }
 0x785   :  { %v2401_v22 = vpop.eup %2400 }
 0x786   :  { %699 = vrot.lane.b32.xlu1 %v2401_v22, %s2548_s4 }
 0x7f3   :  { %v722_v23 = vpop.permute.xlu0 %721 }
 0x7f4   :  { %v724_v24 = vmul.f32 %v722_v23, %v707_v2 }
 0x7f6   :  { %726 = vrot.lane.b32.xlu0 %v724_v24, %s2549_s25 }
 0x7f8   :  { %v700_v25 = vpop.permute.xlu1 %699 }
 0x7f9   :  { %v702_v26 = vmul.f32 %v700_v25, %v685_v4 }
 0x7fb   :  { %802 = vrot.lane.b32.xlu1 %v702_v26, %s2549_s25 }
 0x868   :  { %v727_v27 = vpop.permute.xlu0 %726 }
 0x869   :  { %2056 = vmatmul.mubr.msk.f32.vlgmr.msra.gmra.mrb[6].mxu1 %vm231_vm1, %v727_v27 }
 0x86a   :  { %2297 = vmatpush1.bf16.msra.mxu1 %v2657_v9  ;;  %990 = vmatprep.mubr.f32.mxu1 %v2547_v0 }
 0x86b   :  { %2299 = vmatprep.subr.bf16.mxu1 %v2679_v16 }
 0x86d   :  { %v803_v28 = vpop.permute.xlu1 %802 }
 0x86e   :  { %2172 = vmatmul.mubr.msk.f32.vlgmr.msra.gmra.mrb[12].mxu0 %vm231_vm1, %v803_v28  ;;  %2301 = vmatpush1.bf16.msra.mxu1 %v2682_v17 }
 0x86f   :  { %2304 = vmatpush3.bf16.msra.mxu0 %v2727_v44  ;;  %2182 = vmatprep.mubr.msk.f32.mxu0 %vm2551_vm5, %v2547_v0 }
 0x870   :  { %2305 = vmatprep.subr.bf16.mxu0 %v2550_v43  ;;  %2309 = vmatprep.subr.bf16.mxu1 %v2655_v8 }
 0x873   :  { %2307 = vmatpush3.bf16.msra.mxu0 %v2748_v50 }
 0x874   :  { %2316 = vmatprep.subr.bf16.mxu0 %v2550_v43 }
 0x93c   :  { %v796_v31 = vpop.f32.mrb[6].mxu1 }
 0x93d   :  { %v899_v32 = vadd.f32 %v796_v31, %v178_v29  ;;  %v798_v33 = vpop.f32.mrb[7].mxu1 }
 0x93f   :  { %2402 = vtanh.f32 %v899_v32 }
 0x941   :  { %v872_v34 = vpop.f32.mrb[12].mxu0 }
 0x942   :  { %v876_v35 = vadd.f32 %v872_v34, %v798_v33  ;;  %v2173_v36 = vpop.f32.mrb[13].mxu0 }
 0x944   :  { %v877_v37 = vadd.f32 %v2799_v6, %v876_v35 }
 0x946   :  { %2404 = vtanh.f32 %v877_v37 }
 0x949   :  { %v2403_v38 = vpop.eup %2402 }
 0x94a   :  { %v901_v40 = vmul.f32 0.5, %v2403_v38 }
 0x94c   :  { %v902_v41 = vadd.f32 0.5, %v901_v40 }
 0x94e   :  { %v903_v42 = vsel %vm2705_vm4, %v2403_v38, %v902_v41 }
 0x94f   :  { %906 = vrot.lane.b32.xlu0 %v903_v42, %s2548_s4  ;;  %v904_v52 = vmul.f32 %v903_v42, %v718_v14 }
 0x950   :  { %v2405_v39 = vpop.eup %2404 }
 0x951   :  { %v879_v57 = vmul.f32 0.5, %v2405_v39 }
 0x953   :  { %v880_v45 = vadd.f32 0.5, %v879_v57 }
 0x955   :  { %v881_v46 = vsel %vm2705_vm4, %v2405_v39, %v880_v45 }
 0x956   :  { %884 = vrot.lane.b32.xlu1 %v881_v46, %s2548_s4  ;;  %v882_v55 = vmul.f32 %v881_v46, %v696_v20 }
 0x9c1   :  { %v907_v47 = vpop.permute.xlu0 %906 }
 0x9c2   :  { %v909_v48 = vmul.f32 %v907_v47, %v903_v42 }
 0x9c4   :  { %911 = vrot.lane.b32.xlu0 %v909_v48, %s2549_s25 }
 0x9c8   :  { %v885_v49 = vpop.permute.xlu1 %884 }
 0x9c9   :  { %v887_v51 = vmul.f32 %v885_v49, %v881_v46  ;;  %v188_v49 = vadd.f32 %v2780_v59, %v2700_v19 }
 0x9cb   :  { %889 = vrot.lane.b32.xlu1 %v887_v51, %s2549_s25 }
 0xa36   :  { %v912_v53 = vpop.permute.xlu0 %911 }
 0xa37   :  { %v914_v54 = vadd.f32 %v912_v53, %v904_v52 }
 0xa39   :  { %2406 = vtanh.f32 %v914_v54 }
 0xa3d   :  { %v890_v56 = vpop.permute.xlu1 %889 }
 0xa3e   :  { %v892_v63 = vadd.f32 %v890_v56, %v882_v55 }
 0xa40   :  { %2408 = vtanh.f32 %v892_v63 }
 0xa43   :  { %v2407_v1 = vpop.eup %2406 }
 0xa44   :  { %917 = vrot.lane.b32.xlu0 %v2407_v1, %s2548_s4 }
 0xa4a   :  { %v2409_v2 = vpop.eup %2408 }
 0xa4b   :  { %895 = vrot.lane.b32.xlu1 %v2409_v2, %s2548_s4 }
 0xab6   :  { %v918_v58 = vpop.permute.xlu0 %917 }
 0xab7   :  { %v920_v3 = vmul.f32 %v918_v58, %v903_v42 }
 0xab9   :  { %922 = vrot.lane.b32.xlu0 %v920_v3, %s2549_s25 }
 0xabd   :  { %v896_v4 = vpop.permute.xlu1 %895 }
 0xabe   :  { %v898_v5 = vmul.f32 %v896_v4, %v881_v46 }
 0xac0   :  { %998 = vrot.lane.b32.xlu1 %v898_v5, %s2549_s25 }
 0xb2b   :  { %v923_v7 = vpop.permute.xlu0 %922 }
 0xb2c   :  { %2058 = vmatmul.mubr.msk.f32.vlgmr.msra.gmra.mrb[8].mxu1 %vm231_vm1, %v923_v7 }
 0xb2d   :  { %2311 = vmatpush1.bf16.msra.mxu1 %v2657_v9  ;;  %1186 = vmatprep.mubr.f32.mxu1 %v2547_v0 }
 0xb2e   :  { %2313 = vmatprep.subr.bf16.mxu1 %v2679_v16 }
 0xb31   :  { %2315 = vmatpush1.bf16.msra.mxu1 %v2682_v17 }
 0xb32   :  { %v999_v10 = vpop.permute.xlu1 %998  ;;  %2323 = vmatprep.subr.bf16.mxu1 %v2655_v8 }
 0xb33   :  { %2183 = vmatmul.mubr.msk.f32.vlgmr.msra.gmra.mrb[14].mxu0 %vm231_vm1, %v999_v10 }
 0xb34   :  { %2318 = vmatpush3.bf16.msra.mxu0 %v2727_v44  ;;  %2193 = vmatprep.mubr.msk.f32.mxu0 %vm2551_vm5, %v2547_v0 }
 0xb35   :  { %2319 = vmatprep.subr.bf16.mxu0 %v2550_v43 }
 0xb38   :  { %2321 = vmatpush3.bf16.msra.mxu0 %v2748_v50 }
 0xb39   :  { %2330 = vmatprep.subr.bf16.mxu0 %v2550_v43 }
 0xbff   :  { %v992_v12 = vpop.f32.mrb[8].mxu1 }
 0xc00   :  { %v1095_v13 = vadd.f32 %v992_v12, %v183_v11  ;;  %v994_v14 = vpop.f32.mrb[9].mxu1 }
 0xc02   :  { %2410 = vtanh.f32 %v1095_v13 }
 0xc06   :  { %v1068_v15 = vpop.f32.mrb[14].mxu0 }
 0xc07   :  { %v1072_v18 = vadd.f32 %v1068_v15, %v994_v14  ;;  %v2184_v20 = vpop.f32.mrb[15].mxu0 }
 0xc09   :  { %v1073_v21 = vadd.f32 %v2799_v6, %v1072_v18 }
 0xc0b   :  { %2412 = vtanh.f32 %v1073_v21 }
 0xc0c   :  { %v2411_v22 = vpop.eup %2410 }
 0xc0d   :  { %v1097_v23 = vmul.f32 0.5, %v2411_v22 }
 0xc0f   :  { %v1098_v24 = vadd.f32 0.5, %v1097_v23 }
 0xc11   :  { %v1099_v25 = vsel %vm2705_vm4, %v2411_v22, %v1098_v24 }
 0xc12   :  { %1102 = vrot.lane.b32.xlu0 %v1099_v25, %s2548_s4  ;;  %v1100_v34 = vmul.f32 %v1099_v25, %v914_v54 }
 0xc15   :  { %v2413_v26 = vpop.eup %2412 }
 0xc16   :  { %v1075_v60 = vmul.f32 0.5, %v2413_v26 }
 0xc18   :  { %v1076_v27 = vadd.f32 0.5, %v1075_v60 }
 0xc1a   :  { %v1077_v28 = vsel %vm2705_vm4, %v2413_v26, %v1076_v27 }
 0xc1b   :  { %1080 = vrot.lane.b32.xlu1 %v1077_v28, %s2548_s4  ;;  %v1078_v37 = vmul.f32 %v1077_v28, %v892_v63 }
 0xc84   :  { %v1103_v29 = vpop.permute.xlu0 %1102 }
 0xc85   :  { %v1105_v31 = vmul.f32 %v1103_v29, %v1099_v25 }
 0xc87   :  { %1107 = vrot.lane.b32.xlu0 %v1105_v31, %s2549_s25  ;;  %v193_v31 = vadd.f32 %v2700_v19, %v2786_v62 }
 0xc8d   :  { %v1081_v32 = vpop.permute.xlu1 %1080 }
 0xc8e   :  { %v1083_v33 = vmul.f32 %v1081_v32, %v1077_v28 }
 0xc90   :  { %1085 = vrot.lane.b32.xlu1 %v1083_v33, %s2549_s25 }
 0xcf9   :  { %v1108_v35 = vpop.permute.xlu0 %1107 }
 0xcfa   :  { %v1110_v36 = vadd.f32 %v1108_v35, %v1100_v34 }
 0xcfc   :  { %2414 = vtanh.f32 %v1110_v36 }
 0xd02   :  { %v1086_v38 = vpop.permute.xlu1 %1085 }
 0xd03   :  { %v1088_v40 = vadd.f32 %v1086_v38, %v1078_v37 }
 0xd05   :  { %2416 = vtanh.f32 %v1088_v40 }
 0xd06   :  { %v2415_v41 = vpop.eup %2414 }
 0xd07   :  { %1113 = vrot.lane.b32.xlu0 %v2415_v41, %s2548_s4 }
 0xd0f   :  { %v2417_v42 = vpop.eup %2416 }
 0xd10   :  { %1091 = vrot.lane.b32.xlu1 %v2417_v42, %s2548_s4 }
 0xd79   :  { %v1114_v39 = vpop.permute.xlu0 %1113 }
 0xd7a   :  { %v1116_v57 = vmul.f32 %v1114_v39, %v1099_v25 }
 0xd7c   :  { %1118 = vrot.lane.b32.xlu0 %v1116_v57, %s2549_s25 }
 0xd82   :  { %v1092_v45 = vpop.permute.xlu1 %1091 }
 0xd83   :  { %v1094_v46 = vmul.f32 %v1092_v45, %v1077_v28 }
 0xd85   :  { %1194 = vrot.lane.b32.xlu1 %v1094_v46, %s2549_s25 }
 0xdee   :  { %v1119_v47 = vpop.permute.xlu0 %1118 }
 0xdef   :  { %2060 = vmatmul.mubr.msk.f32.vlgmr.msra.gmra.mrb[10].mxu1 %vm231_vm1, %v1119_v47 }
 0xdf0   :  { %2325 = vmatpush1.bf16.msra.mxu1 %v2657_v9  ;;  %1382 = vmatprep.mubr.f32.mxu1 %v2547_v0 }
 0xdf1   :  { %2327 = vmatprep.subr.bf16.mxu1 %v2679_v16 }
 0xdf4   :  { %2329 = vmatpush1.bf16.msra.mxu1 %v2682_v17 }
 0xdf5   :  { %2337 = vmatprep.subr.bf16.mxu1 %v2655_v8 }
 0xdf7   :  { %v1195_v48 = vpop.permute.xlu1 %1194 }
 0xdf8   :  { %2194 = vmatmul.mubr.msk.f32.vlgmr.msra.gmra.mrb[16].mxu0 %vm231_vm1, %v1195_v48 }
 0xdf9   :  { %2332 = vmatpush3.bf16.msra.mxu0 %v2727_v44  ;;  %2204 = vmatprep.mubr.msk.f32.mxu0 %vm2551_vm5, %v2547_v0 }
 0xdfa   :  { %2333 = vmatprep.subr.bf16.mxu0 %v2550_v43 }
 0xdfd   :  { %2335 = vmatpush3.bf16.msra.mxu0 %v2748_v50 }
 0xdfe   :  { %2344 = vmatprep.subr.bf16.mxu0 %v2550_v43 }
 0xec2   :  { %v1188_v51 = vpop.f32.mrb[10].mxu1 }
 0xec3   :  { %v1291_v52 = vadd.f32 %v1188_v51, %v188_v49  ;;  %v1190_v53 = vpop.f32.mrb[11].mxu1 }
 0xec5   :  { %2418 = vtanh.f32 %v1291_v52 }
 0xecb   :  { %v1264_v54 = vpop.f32.mrb[16].mxu0 }
 0xecc   :  { %v1268_v55 = vadd.f32 %v1264_v54, %v1190_v53  ;;  %v2195_v56 = vpop.f32.mrb[17].mxu0 }
 0xece   :  { %v1269_v63 = vadd.f32 %v2799_v6, %v1268_v55 }
 0xecf   :  { %v2419_v1 = vpop.eup %2418 }
 0xed0   :  { %2420 = vtanh.f32 %v1269_v63  ;;  %v1293_v2 = vmul.f32 0.5, %v2419_v1 }
 0xed2   :  { %v1294_v58 = vadd.f32 0.5, %v1293_v2 }
 0xed4   :  { %v1295_v3 = vsel %vm2705_vm4, %v2419_v1, %v1294_v58 }
 0xed5   :  { %1298 = vrot.lane.b32.xlu0 %v1295_v3, %s2548_s4  ;;  %v1296_v14 = vmul.f32 %v1295_v3, %v1110_v36 }
 0xeda   :  { %v2421_v4 = vpop.eup %2420 }
 0xedb   :  { %v1271_v59 = vmul.f32 0.5, %v2421_v4 }
 0xedd   :  { %v1272_v5 = vadd.f32 0.5, %v1271_v59 }
 0xedf   :  { %v1273_v7 = vsel %vm2705_vm4, %v2421_v4, %v1272_v5 }
 0xee0   :  { %1276 = vrot.lane.b32.xlu1 %v1273_v7, %s2548_s4  ;;  %v1274_v20 = vmul.f32 %v1273_v7, %v1088_v40 }
 0xf47   :  { %v1299_v10 = vpop.permute.xlu0 %1298 }
 0xf48   :  { %v1301_v11 = vmul.f32 %v1299_v10, %v1295_v3 }
 0xf4a   :  { %1303 = vrot.lane.b32.xlu0 %v1301_v11, %s2549_s25 }
 0xf52   :  { %v1277_v12 = vpop.permute.xlu1 %1276 }
 0xf53   :  { %v1279_v13 = vmul.f32 %v1277_v12, %v1273_v7 }
 0xf55   :  { %1281 = vrot.lane.b32.xlu1 %v1279_v13, %s2549_s25 }
 0xfbc   :  { %v1304_v15 = vpop.permute.xlu0 %1303 }
 0xfbd   :  { %v1306_v18 = vadd.f32 %v1304_v15, %v1296_v14 }
 0xfbf   :  { %2422 = vtanh.f32 %v1306_v18 }
 0xfc7   :  { %v1282_v21 = vpop.permute.xlu1 %1281 }
 0xfc8   :  { %v1284_v22 = vadd.f32 %v1282_v21, %v1274_v20 }
 0xfc9   :  { %v2423_v23 = vpop.eup %2422 }
 0xfca   :  { %2424 = vtanh.f32 %v1284_v22  ;;  %1309 = vrot.lane.b32.xlu0 %v2423_v23, %s2548_s4 }
 0xfd4   :  { %v2425_v24 = vpop.eup %2424 }
 0xfd5   :  { %1287 = vrot.lane.b32.xlu1 %v2425_v24, %s2548_s4 }
0x103c   :  { %v1310_v25 = vpop.permute.xlu0 %1309 }
0x103d   :  { %v1312_v26 = vmul.f32 %v1310_v25, %v1295_v3 }
0x103f   :  { %1314 = vrot.lane.b32.xlu0 %v1312_v26, %s2549_s25 }
0x1047   :  { %v1288_v60 = vpop.permute.xlu1 %1287 }
0x1048   :  { %v1290_v27 = vmul.f32 %v1288_v60, %v1273_v7 }
0x104a   :  { %1390 = vrot.lane.b32.xlu1 %v1290_v27, %s2549_s25 }
0x10b1   :  { %v1315_v28 = vpop.permute.xlu0 %1314 }
0x10b2   :  { %2062 = vmatmul.mubr.msk.f32.vlgmr.msra.gmra.mrb[12].mxu1 %vm231_vm1, %v1315_v28 }
0x10b3   :  { %2339 = vmatpush1.bf16.msra.mxu1 %v2657_v9  ;;  %1578 = vmatprep.mubr.f32.mxu1 %v2547_v0 }
0x10b4   :  { %2341 = vmatprep.subr.bf16.mxu1 %v2679_v16 }
0x10b7   :  { %2343 = vmatpush1.bf16.msra.mxu1 %v2682_v17 }
0x10b8   :  { %2351 = vmatprep.subr.bf16.mxu1 %v2655_v8 }
0x10bc   :  { %v1391_v29 = vpop.permute.xlu1 %1390 }
0x10bd   :  { %2205 = vmatmul.mubr.msk.f32.vlgmr.msra.gmra.mrb[18].mxu0 %vm231_vm1, %v1391_v29 }
0x10be   :  { %2346 = vmatpush3.bf16.msra.mxu0 %v2727_v44  ;;  %2215 = vmatprep.mubr.msk.f32.mxu0 %vm2551_vm5, %v2547_v0 }
0x10bf   :  { %2347 = vmatprep.subr.bf16.mxu0 %v2550_v43 }
0x10c2   :  { %2349 = vmatpush3.bf16.msra.mxu0 %v2748_v50 }
0x10c3   :  { %2358 = vmatprep.subr.bf16.mxu0 %v2550_v43 }
0x1185   :  { %v1384_v32 = vpop.f32.mrb[12].mxu1 }
0x1186   :  { %v1487_v33 = vadd.f32 %v1384_v32, %v193_v31  ;;  %v1386_v8 = vpop.f32.mrb[13].mxu1 }
0x1188   :  { %2426 = vtanh.f32 %v1487_v33 }
0x1190   :  { %v1460_v34 = vpop.f32.mrb[18].mxu0 }
0x1191   :  { %v1464_v35 = vadd.f32 %v1460_v34, %v1386_v8  ;;  %v2206_v36 = vpop.f32.mrb[19].mxu0 }
0x1192   :  { %v2427_v37 = vpop.eup %2426 }
0x1193   :  { %v1465_v38 = vadd.f32 %v2799_v6, %v1464_v35  ;;  %v1489_v40 = vmul.f32 0.5, %v2427_v37 }
0x1195   :  { %2428 = vtanh.f32 %v1465_v38  ;;  %v1490_v41 = vadd.f32 0.5, %v1489_v40 }
0x1197   :  { %v1491_v42 = vsel %vm2705_vm4, %v2427_v37, %v1490_v41 }
0x1198   :  { %1494 = vrot.lane.b32.xlu0 %v1491_v42, %s2548_s4  ;;  %v1492_v51 = vmul.f32 %v1491_v42, %v1306_v18 }
0x119f   :  { %v2429_v39 = vpop.eup %2428 }
0x11a0   :  { %v1467_v62 = vmul.f32 0.5, %v2429_v39 }
0x11a2   :  { %v1468_v57 = vadd.f32 0.5, %v1467_v62 }
0x11a4   :  { %v1469_v45 = vsel %vm2705_vm4, %v2429_v39, %v1468_v57 }
0x11a5   :  { %1472 = vrot.lane.b32.xlu1 %v1469_v45, %s2548_s4  ;;  %v1470_v54 = vmul.f32 %v1469_v45, %v1284_v22 }
0x120a   :  { %v1495_v46 = vpop.permute.xlu0 %1494 }
0x120b   :  { %v1497_v47 = vmul.f32 %v1495_v46, %v1491_v42 }
0x120d   :  { %1499 = vrot.lane.b32.xlu0 %v1497_v47, %s2549_s25 }
0x1217   :  { %v1473_v48 = vpop.permute.xlu1 %1472 }
0x1218   :  { %v1475_v49 = vmul.f32 %v1473_v48, %v1469_v45 }
0x121a   :  { %1477 = vrot.lane.b32.xlu1 %v1475_v49, %s2549_s25 }
0x127f   :  { %v1500_v52 = vpop.permute.xlu0 %1499 }
0x1280   :  { %v1502_v53 = vadd.f32 %v1500_v52, %v1492_v51 }
0x1282   :  { %2430 = vtanh.f32 %v1502_v53 }
0x128c   :  { %v2431_v55 = vpop.eup %2430  ;;  %v1478_v56 = vpop.permute.xlu1 %1477 }
0x128d   :  { %v1480_v63 = vadd.f32 %v1478_v56, %v1470_v54  ;;  %1505 = vrot.lane.b32.xlu0 %v2431_v55, %s2548_s4  ;;  %v1900_v55 = vld [vmem:[%s3072_s8 + $0x18] sm:$0xff] }
0x128e   :  { %v2368_v56 = vpack.c.bf16 %v1900_v55, %v1899_v30 }
0x128f   :  { %2432 = vtanh.f32 %v1480_v63 }
0x1299   :  { %v2433_v1 = vpop.eup %2432 }
0x129a   :  { %1483 = vrot.lane.b32.xlu1 %v2433_v1, %s2548_s4 }
0x12ff   :  { %v1506_v2 = vpop.permute.xlu0 %1505 }
0x1300   :  { %v1508_v58 = vmul.f32 %v1506_v2, %v1491_v42 }
0x1302   :  { %1510 = vrot.lane.b32.xlu0 %v1508_v58, %s2549_s25 }
0x130c   :  { %v1484_v3 = vpop.permute.xlu1 %1483 }
0x130d   :  { %v1486_v4 = vmul.f32 %v1484_v3, %v1469_v45  ;;  %v2068_v3 = vld [vmem:[%s3073_s9] ss:$0 sm:$0xff]  ;;  %s2553_s9 = smov [#allocation6]  }
0x130f   :  { %1586 = vrot.lane.b32.xlu1 %v1486_v4, %s2549_s25 }
0x1374   :  { %v1511_v59 = vpop.permute.xlu0 %1510 }
0x1375   :  { %2064 = vmatmul.mubr.msk.f32.vlgmr.msra.gmra.mrb[14].mxu1 %vm231_vm1, %v1511_v59 }
0x1376   :  { %2353 = vmatpush1.bf16.msra.mxu1 %v2657_v9  ;;  %1774 = vmatprep.mubr.f32.mxu1 %v2547_v0  ;;  %v198_v9 = vadd.f32 %v2784_v61, %v2700_v19 }
0x1377   :  { %2355 = vmatprep.subr.bf16.mxu1 %v2679_v16 }
0x137a   :  { %2357 = vmatpush1.bf16.msra.mxu1 %v2682_v17 }
0x137b   :  { %2364 = vmatprep.subr.bf16.mxu1 %v2550_v43 }
0x1381   :  { %v1587_v5 = vpop.permute.xlu1 %1586 }
0x1382   :  { %2216 = vmatmul.mubr.msk.f32.vlgmr.msra.gmra.mrb[20].mxu0 %vm231_vm1, %v1587_v5 }
0x1383   :  { %2360 = vmatpush3.bf16.msra.mxu0 %v2727_v44  ;;  %2226 = vmatprep.mubr.msk.f32.mxu0 %vm2551_vm5, %v2547_v0 }
0x1384   :  { %2361 = vmatprep.subr.bf16.mxu0 %v2550_v43 }
0x1387   :  { %2363 = vmatpush3.bf16.msra.mxu0 %v2748_v50 }
0x1448   :  { %v1580_v16 = vpop.f32.mrb[14].mxu1 }
0x1449   :  { %v1683_v7 = vadd.f32 %v1580_v16, %v198_v9  ;;  %v1582_v17 = vpop.f32.mrb[15].mxu1 }
0x144b   :  { %2434 = vtanh.f32 %v1683_v7 }
0x1455   :  { %v2435_v10 = vpop.eup %2434  ;;  %v1656_v11 = vpop.f32.mrb[20].mxu0 }
0x1456   :  { %v1660_v12 = vadd.f32 %v1656_v11, %v1582_v17  ;;  %v2217_v13 = vpop.f32.mrb[21].mxu0  ;;  %v1685_v14 = vmul.f32 0.5, %v2435_v10 }
0x1458   :  { %v1661_v44 = vadd.f32 %v2799_v6, %v1660_v12  ;;  %v1686_v15 = vadd.f32 0.5, %v1685_v14 }
0x145a   :  { %2436 = vtanh.f32 %v1661_v44  ;;  %v1687_v18 = vsel %vm2705_vm4, %v2435_v10, %v1686_v15 }
0x145b   :  { %1690 = vrot.lane.b32.xlu0 %v1687_v18, %s2548_s4  ;;  %v1688_v25 = vmul.f32 %v1687_v18, %v1502_v53  ;;  %v1898_v53 = vld [vmem:[%s3072_s8 + $0x8] sm:$0xff] }
0x1464   :  { %v2437_v50 = vpop.eup %2436 }
0x1465   :  { %v1663_v19 = vmul.f32 0.5, %v2437_v50 }
0x1467   :  { %v1664_v61 = vadd.f32 0.5, %v1663_v19 }
0x1469   :  { %v1665_v20 = vsel %vm2705_vm4, %v2437_v50, %v1664_v61 }
0x146a   :  { %1668 = vrot.lane.b32.xlu1 %v1665_v20, %s2548_s4  ;;  %v1666_v28 = vmul.f32 %v1665_v20, %v1480_v63 }
0x14cd   :  { %v1691_v21 = vpop.permute.xlu0 %1690 }
0x14ce   :  { %v1693_v22 = vmul.f32 %v1691_v21, %v1687_v18 }
0x14d0   :  { %1695 = vrot.lane.b32.xlu0 %v1693_v22, %s2549_s25 }
0x14dc   :  { %v1669_v23 = vpop.permute.xlu1 %1668 }
0x14dd   :  { %v1671_v24 = vmul.f32 %v1669_v23, %v1665_v20 }
0x14df   :  { %1673 = vrot.lane.b32.xlu1 %v1671_v24, %s2549_s25 }
0x1542   :  { %v1696_v26 = vpop.permute.xlu0 %1695 }
0x1543   :  { %v2979_v60 = vadd.f32 %v1696_v26, %v1688_v25 }
0x1545   :  { %2438 = vtanh.f32 %v2979_v60 }
0x154f   :  { %v2439_v27 = vpop.eup %2438 }
0x1550   :  { %1701 = vrot.lane.b32.xlu0 %v2439_v27, %s2548_s4 }
0x1551   :  { %v1674_v29 = vpop.permute.xlu1 %1673 }
0x1552   :  { %v1676_v31 = vadd.f32 %v1674_v29, %v1666_v28 }
0x1554   :  { %2440 = vtanh.f32 %v1676_v31 }
0x155e   :  { %v2441_v32 = vpop.eup %2440 }
0x155f   :  { %1679 = vrot.lane.b32.xlu1 %v2441_v32, %s2548_s4 }
0x15c2   :  { %v1702_v33 = vpop.permute.xlu0 %1701 }
0x15c3   :  { %v1704_v8 = vmul.f32 %v1702_v33, %v1687_v18 }
0x15c5   :  { %1706 = vrot.lane.b32.xlu0 %v1704_v8, %s2549_s25 }
0x15d1   :  { %v1680_v34 = vpop.permute.xlu1 %1679 }
0x15d2   :  { %v1682_v35 = vmul.f32 %v1680_v34, %v1665_v20 }
0x15d4   :  { %1781 = vrot.lane.b32.xlu1 %v1682_v35, %s2549_s25 }
0x1637   :  { %v1707_v36 = vpop.permute.xlu0 %1706 }
0x1638   :  { %1879 = vst.msk [vmem:[#allocation6] sm:$0xff] %vm231_vm1, %v1707_v36  ;;  %2066 = vmatmul.mubr.msk.f32.vlgmr.msra.gmra.mrb[16].mxu1 %vm231_vm1, %v1707_v36 }
0x1639   :  { %2237 = vmatprep.mubr.msk.f32.mxu1 %vm2551_vm5, %v2547_v0 }
0x1646   :  { %v1782_v37 = vpop.permute.xlu1 %1781 }
0x1647   :  { %2227 = vmatmul.mubr.msk.f32.vlgmr.msra.gmra.mrb[22].mxu0 %vm231_vm1, %v1782_v37 }
0x170b   :  { %v1776_v38 = vpop.f32.mrb[16].mxu1 }
0x170c   :  { %v1777_v40 = vpop.f32.mrb[17].mxu1 }
0x171a   :  { %v1851_v41 = vpop.f32.mrb[22].mxu0 }
0x171b   :  { %v1855_v42 = vadd.f32 %v1851_v41, %v1777_v40  ;;  %v2228_v39 = vpop.f32.mrb[23].mxu0 }
0x171d   :  { %v1856_v62 = vadd.f32 %v2799_v6, %v1855_v42  ;;  %v1897_v6 = vld [vmem:[%s3072_s8] sm:$0xff]  ;;  %s2552_s8 = smov 96  }
0x171e   :  { %v2365_v54 = vpack.c.bf16 %v1898_v53, %v1897_v6 }
0x171f   :  { %2442 = vtanh.f32 %v1856_v62 }
0x1720   :  { %2366 = vmatpush3.bf16.msra.mxu1 %v2365_v54 }
0x1721   :  { %2367 = vmatprep.subr.bf16.mxu1 %v2550_v43 }
0x1724   :  { %2369 = vmatpush3.bf16.msra.mxu1 %v2368_v56 }
0x1729   :  { %v2443_v57 = vpop.eup %2442 }
0x172a   :  { %v1858_v45 = vmul.f32 0.5, %v2443_v57 }
0x172c   :  { %v1859_v46 = vadd.f32 0.5, %v1858_v45 }
0x172e   :  { %v1860_v47 = vsel %vm2705_vm4, %v2443_v57, %v1859_v46 }
0x172f   :  { %1863 = vrot.lane.b32.xlu0 %v1860_v47, %s2548_s4  ;;  %v1861_v49 = vmul.f32 %v1860_v47, %v1676_v31 }
0x17a1   :  { %v1864_v0 = vpop.permute.xlu0 %1863 }
0x17a2   :  { %v1866_v48 = vmul.f32 %v1864_v0, %v1860_v47 }
0x17a4   :  { %1868 = vrot.lane.b32.xlu1 %v1866_v48, %s2549_s25 }
0x1816   :  { %v1869_v51 = vpop.permute.xlu1 %1868 }
0x1817   :  { %v1871_v52 = vadd.f32 %v1869_v51, %v1861_v49 }
0x1819   :  { %2444 = vtanh.f32 %v1871_v52 }
0x1823   :  { %v2445_v63 = vpop.eup %2444 }
0x1824   :  { %1874 = vrot.lane.b32.xlu0 %v2445_v63, %s2548_s4  ;;  %s2009_s4 = sshll.u32 %s2553_s9, 4  ;;  %s2010_s4 = int_to_ptr.vmem [resolvable:$true] %s2009_s4 }
0x1825   :  { %p2477_p9 = scmp.lt.s32.totalorder %s2010_s4, %s2010_s4 }
0x1896   :  { %v1875_v1 = vpop.permute.xlu0 %1874 }
0x1897   :  { %v1877_v2 = vmul.f32 %v1875_v1, %v1860_v47 }
0x1899   :  { %1881 = vrot.lane.b32.xlu1 %v1877_v2, %s2549_s25  ;;  %s2472_s25 = scalar_lea.vmem %s2010_s4, 256 }
0x189a   :  { %p2473_p8 = scmp.ne.s32.totalorder %s2010_s4, %s2472_s25  ;;  %p2478_p10 = scmp.lt.s32.totalorder %s2472_s25, %s2472_s25 }
0x189c   :  { %p2479_p11 = por %p2478_p10, %p2477_p9 }
0x189e   :  { %p2480_p12 = pnand %p2479_p11, %p2473_p8 }
0x190b   :  { %v1882_v58 = vpop.permute.xlu1 %1881 }
0x190c   :  { %1885 = vst.msk [vmem:[#allocation6 + $0x8] sm:$0xff] %vm231_vm1, %v1882_v58  ;;  %2238 = vmatmul.mubr.msk.f32.vlgmr.msra.gmra.mrb[18].mxu1 %vm231_vm1, %v1882_v58 }
0x19df   :  { %v1976_v4 = vpop.f32.mrb[18].mxu1 }
0x19e0   :  { %v1977_v43 = vadd.f32 %v2068_v3, %v1976_v4  ;;  %v2239_v59 = vpop.f32.mrb[19].mxu1 }
0x19e2   :  { %v1981_v5 = vsel %vm1980_vm6, %v1977_v43, -inf }
0x19e3   :  { %1982 = vmax.xlane.f32.xlu0 %v1981_v5 }
0x19f9   :  { %1887 = vrot.lane.b32.xlu0 %v2979_v60, %s2552_s8 }
0x1a70   :  { %v1983_v9 = vpop.xlane.xlu0 %1982 }
0x1a71   :  { %v1984_v16 = vsub.f32 %v1977_v43, %v1983_v9 }
0x1a73   :  { %v1985_v7 = vmul.f32 1.442695, %v1984_v16 }
0x1a74   :  { %v1888_v17 = vpop.permute.xlu0 %1887 }
0x1a75   :  { %2446 = vpow2.f32 %v1985_v7  ;;  %1890 = vst.msk [vmem:[#allocation8] sm:$0xff] %vm231_vm1, %v1888_v17 }
0x1a7f   :  { %v2447_v10 = vpop.eup %2446 }
0x1a80   :  { %v1987_v11 = vsel %vm1980_vm6, %v2447_v10, 0.0 }
0x1a81   :  { %1988 = vadd.xlane.f32.xlu1 %v1987_v11 }
0x1a92   :  { %1892 = vrot.lane.b32.xlu1 %v1871_v52, %s2552_s8 }
0x1a93   :  { %2483 = shalt.err (!%p2480_p12)
}
0x1a94   :  { %s2484_s5 = scalar_lea.hbm %s3075_s11, 256 }
0x1a95   :  { %p2485_p13 = scmp.ne.s32.totalorder %s3075_s11, %s2484_s5  ;;  %p2488_p0 = scmp.lt.u32.totalorder %s2484_s5, %s3075_s11 }
0x1a97   :  { %p2490_p1 = pnand %p2488_p0, %p2485_p13 }
0x1a99   :  { %2493 = shalt.err (!%p2490_p1)
}
0x1a9a   :  { %2015 = dma.vmem_to_hbm [thread:$0]  %s2010_s4, 256, %s3075_s11, [#allocation7], %s2545_s13, %s2545_s13, %s2546_s14  }
0x1a9b   :  { %s2554_s3 = smov [#allocation8]  }
0x1a9c   :  { %s2021_s0 = sshll.u32 %s2554_s3, 4  ;;  %s2022_s0 = int_to_ptr.vmem [resolvable:$true] %s2021_s0 }
0x1a9d   :  { %s2494_s1 = scalar_lea.vmem %s2022_s0, 256  ;;  %p2499_p3 = scmp.lt.s32.totalorder %s2022_s0, %s2022_s0 }
0x1a9e   :  { %p2495_p2 = scmp.ne.s32.totalorder %s2022_s0, %s2494_s1  ;;  %p2500_p4 = scmp.lt.s32.totalorder %s2494_s1, %s2494_s1 }
0x1aa0   :  { %p2501_p5 = por %p2500_p4, %p2499_p3 }
0x1aa2   :  { %p2502_p6 = pnand %p2501_p5, %p2495_p2 }
0x1b0e   :  { %v1989_v12 = vpop.xlane.xlu1 %1988 }
0x1b0f   :  { %2448 = vlog2.f32 %v1989_v12 }
0x1b12   :  { %v1893_v13 = vpop.permute.xlu1 %1892 }
0x1b13   :  { %1896 = vst.msk [vmem:[#allocation8 + $0x8] sm:$0xff] %vm231_vm1, %v1893_v13 }
0x1b14   :  { %2505 = shalt.err (!%p2502_p6)
}
0x1b15   :  { %s2506_s29 = scalar_lea.hbm %s3076_s12, 256 }
0x1b16   :  { %p2507_p7 = scmp.ne.s32.totalorder %s3076_s12, %s2506_s29  ;;  %p2510_p8 = scmp.lt.u32.totalorder %s2506_s29, %s3076_s12 }
0x1b18   :  { %p2512_p9 = pnand %p2510_p8, %p2507_p7 }
0x1b1a   :  { %2515 = shalt.err (!%p2512_p9)
}
0x1b1b   :  { %2027 = dma.vmem_to_hbm [thread:$0]  %s2022_s0, 256, %s3076_s12, [#allocation7], %s2545_s13, %s2545_s13, %s2546_s14   ;;  %v2449_v14 = vpop.eup %2448 }
0x1b1c   :  { %s2555_s19 = smov [#allocation5]   ;;  %v1991_v44 = vmul.f32 0.6931472, %v2449_v14 }
0x1b1d   :  { %s2000_s20 = sshll.u32 %s2555_s19, 4  ;;  %s2001_s20 = int_to_ptr.vmem [resolvable:$true] %s2000_s20 }
0x1b1e   :  { %v1992_v15 = vsub.f32 %v1984_v16, %v1991_v44  ;;  %s2516_s8 = scalar_lea.vmem %s2001_s20, 128  ;;  %p2521_p11 = scmp.lt.s32.totalorder %s2001_s20, %s2001_s20 }
0x1b1f   :  { %p2517_p10 = scmp.ne.s32.totalorder %s2001_s20, %s2516_s8  ;;  %p2522_p12 = scmp.lt.s32.totalorder %s2516_s8, %s2516_s8 }
0x1b20   :  { %1993 = vst.msk [vmem:[#allocation5] sm:$0xff] %vm1980_vm6, %v1992_v15 }
0x1b21   :  { %p2523_p13 = por %p2522_p12, %p2521_p11 }
0x1b23   :  { %p2524_p0 = pnand %p2523_p13, %p2517_p10 }
0x1b25   :  { %2527 = shalt.err (!%p2524_p0)
}
0x1b26   :  { %s2528_s25 = scalar_lea.hbm %s3074_s10, 128 }
0x1b27   :  { %p2529_p1 = scmp.ne.s32.totalorder %s3074_s10, %s2528_s25  ;;  %p2532_p2 = scmp.lt.u32.totalorder %s2528_s25, %s3074_s10 }
0x1b29   :  { %p2534_p3 = pnand %p2532_p2, %p2529_p1 }
0x1b2b   :  { %2537 = shalt.err (!%p2534_p3)
}
0x1b2c   :  { %2003 = dma.vmem_to_hbm [thread:$0]  %s2001_s20, 128, %s3074_s10, [#allocation4]  }
0x1b2d   :  { %2540 = dma.done.wait [#allocation4], 128  }
0x1b2e   :  { %2541 = vsyncadd [#allocation4], 4294967168 }
0x1b2f   :  { %2542 = dma.done.wait [#allocation7], 512  }
0x1b30   :  { %2543 = vsyncadd [#allocation7], 4294966784 }
0x1b31   :  { %2037 = vsyncpa [#allocation3], 1 }
0x1b32   :  { %2038 = vsyncpa [#allocation4], 1 }
0x1b33   :  { %2039 = vsyncpa [#allocation7], 1 }

</bundles_post_ra>
